<compile_context>
chip_gen: v5e
topology: v5e:2x2
jax: 0.10.0
libtpu: 0.0.40
codegen_flags: <defaults>
</compile_context>

<pallas_src>
import math

import jax
import jax.numpy as jnp
from jax import lax
from jax.experimental import pallas as pl
from jax.experimental.pallas import tpu as pltpu

# ---- module hyper-parameters (from __init__ defaults) -----------------------
MIN_VALUE = -0.5
MAX_VALUE = 3.0
FEATURES = 20
EPSILON = 1e-11
CUT_DIST_BOHR = 2.5          # cut_dist_bohr constructor arg
SELF_SEND = True             # is_self_interacting


def _expansion_kernel(tgt_ref, srcT_ref, dist_ref, dir_ref, exp_ref):
    """One (batch, Nt-tile, Ns-tile) block per grid step.

    tgt_ref  : (1, TQ, 3)          target xyz rows
    srcT_ref : (1, 3, TK)          source xyz, coordinate-major (lane-dense on Ns)
    dist_ref : (1, TQ, TK)
    dir_ref  : (1, 3, TQ, TK)      coordinate-major direction
    exp_ref  : (1, FEATURES, TQ, TK)  feature-major bessel expansion
    """
    tx = tgt_ref[0, :, 0:1]      # (TQ, 1)
    ty = tgt_ref[0, :, 1:2]
    tz = tgt_ref[0, :, 2:3]
    sx = srcT_ref[0, 0:1, :]     # (1, TK)
    sy = srcT_ref[0, 1:2, :]
    sz = srcT_ref[0, 2:3, :]

    # Per-coordinate lane-dense (TQ, TK) planes — no (Nt, Ns, 3) intermediate.
    dx = tx - sx
    dy = ty - sy
    dz = tz - sz

    d2 = dx * dx + dy * dy + dz * dz
    dist = jnp.sqrt(d2)                                   # (TQ, TK)
    inv_d = jnp.where(d2 > 0.0, 1.0 / dist, 0.0)          # 0 on coincident pairs

    dist_ref[0] = dist
    dir_ref[0, 0] = dx * inv_d
    dir_ref[0, 1] = dy * inv_d
    dir_ref[0, 2] = dz * inv_d

    # --- soft_one_hot_linspace, basis='bessel', cutoff=True (e3nn semantics) --
    #   x = dist + eps - start ; c = end - start
    #   out_n = sqrt(2/c) * sin(n*pi*x/c) / x,  n = 1..FEATURES
    #   cutoff: out *= (x/c < 1) * (x > 0)
    c = MAX_VALUE - MIN_VALUE
    x = (dist + EPSILON) - MIN_VALUE
    keep = ((x < c) & (x > 0.0)).astype(jnp.float32)
    scale = (math.sqrt(2.0 / c) * keep) * pl.reciprocal(x, approx=False)

    # sin(n*theta) via recurrence: s_{n+1} = 2*cos(theta)*s_n - s_{n-1}.
    # Only 2 transcendentals (sin, cos) per pair instead of FEATURES sins.
    theta = (math.pi / c) * x
    s_cur = jnp.sin(theta)                                # sin(1*theta)
    two_cos = 2.0 * jnp.cos(theta)
    s_prev = jnp.zeros_like(x)                            # sin(0*theta)
    exp_ref[0, 0] = scale * s_cur
    for n in range(1, FEATURES):                          # unrolled at trace time
        s_next = two_cos * s_cur - s_prev
        s_prev, s_cur = s_cur, s_next
        exp_ref[0, n] = scale * s_cur


def _pick_tile(n, preferred, quantum):
    """Largest tile <= preferred that is a multiple of `quantum` and divides n;
    fall back to the full extent (always a legal block shape)."""
    if n <= preferred:
        return n
    t = (min(preferred, n) // quantum) * quantum
    while t >= quantum:
        if n % t == 0:
            return t
        t -= quantum
    return n


def deep_df_text0_expansion(source, target, *, tq=256, tk=512,
                            vmem_limit_bytes=64 * 1024 * 1024):
    """source: (B, Ns, 3) f32, target: (B, Nt, 3) f32.

    Returns (dist, direction, mask, expansion) matching the PyTorch module:
      dist      (B, Nt, Ns, 1) f32
      direction (B, Nt, Ns, 3) f32
      mask      (B, Nt, Ns, 1) bool
      expansion (B, Nt, Ns, FEATURES) f32
    """
    B, Ns, _ = source.shape
    _, Nt, _ = target.shape
    source = source.astype(jnp.float32)
    target = target.astype(jnp.float32)

    # Coordinate-major source so every in-kernel plane is lane-dense on Ns.
    source_t = jnp.transpose(source, (0, 2, 1))            # (B, 3, Ns)

    # Tile the pair matrix; tiles satisfy the (8, 128) constraint or are full.
    TQ = _pick_tile(Nt, tq, 8)
    TK = _pick_tile(Ns, tk, 128)
    grid = (B, Nt // TQ, Ns // TK)

    out_shapes = (
        jax.ShapeDtypeStruct((B, Nt, Ns), jnp.float32),            # dist
        jax.ShapeDtypeStruct((B, 3, Nt, Ns), jnp.float32),         # direction (coord-major)
        jax.ShapeDtypeStruct((B, FEATURES, Nt, Ns), jnp.float32),  # expansion (feat-major)
    )

    grid_spec = pltpu.PrefetchScalarGridSpec(
        num_scalar_prefetch=0,
        grid=grid,
        in_specs=[
            pl.BlockSpec((1, TQ, 3), lambda b, q, k: (b, q, 0)),       # target
            pl.BlockSpec((1, 3, TK), lambda b, q, k: (b, 0, k)),       # source (coord-major)
        ],
        out_specs=[
            pl.BlockSpec((1, TQ, TK), lambda b, q, k: (b, q, k)),
            pl.BlockSpec((1, 3, TQ, TK), lambda b, q, k: (b, 0, q, k)),
            pl.BlockSpec((1, FEATURES, TQ, TK), lambda b, q, k: (b, 0, q, k)),
        ],
    )

    dist, dir_cm, exp_fm = pl.pallas_call(
        _expansion_kernel,
        out_shape=out_shapes,
        grid_spec=grid_spec,
        compiler_params=pltpu.CompilerParams(
            dimension_semantics=("parallel", "parallel", "arbitrary"),
            vmem_limit_bytes=vmem_limit_bytes),
    )(target, source_t)

    # Back to the PyTorch module's layouts (cheap fused XLA ops in the wrapper).
    direction = jnp.transpose(dir_cm, (0, 2, 3, 1))         # (B, Nt, Ns, 3)
    expansion = jnp.transpose(exp_fm, (0, 2, 3, 1))         # (B, Nt, Ns, FEATURES)

    if SELF_SEND:
        mask = dist < CUT_DIST_BOHR
    else:
        mask = (dist < CUT_DIST_BOHR) & (dist > 0.0)

    return dist[..., None], direction, mask[..., None], expansion


if __name__ == "__main__":
    key = jax.random.PRNGKey(0)
    k1, k2 = jax.random.split(key)
    B, Ns, Nt = 2, 256, 64
    # small synthetic point clouds (Bohr units), deterministic
    source = jax.random.uniform(k1, (B, Ns, 3), jnp.float32, minval=-1.5, maxval=1.5)
    target = jax.random.uniform(k2, (B, Nt, 3), jnp.float32, minval=-1.5, maxval=1.5)

    # small tiles so the demo also exercises the (B, Nt-tile, Ns-tile) grid path
    dist, direction, mask, expansion = deep_df_text0_expansion(
        source, target, tq=32, tk=128)
    jax.block_until_ready((dist, direction, mask, expansion))

    # lightweight sanity checks against a pure-JAX reference
    diff_ref = target[:, :, None, :] - source[:, None, :, :]
    dist_ref = jnp.sqrt(jnp.sum(diff_ref * diff_ref, axis=-1))        # (B, Nt, Ns)
    safe = jnp.where(dist_ref > 0.0, dist_ref, 1.0)
    dir_ref = jnp.where(dist_ref[..., None] > 0.0, diff_ref / safe[..., None], 0.0)
    x_ref = dist_ref + EPSILON - MIN_VALUE
    c_ref = MAX_VALUE - MIN_VALUE
    n_ref = jnp.arange(1, FEATURES + 1, dtype=jnp.float32) * math.pi
    exp_ref = (math.sqrt(2.0 / c_ref)
               * jnp.sin(n_ref * x_ref[..., None] / c_ref) / x_ref[..., None])
    exp_ref = exp_ref * (((x_ref[..., None] / c_ref) < 1.0)
                         & (x_ref[..., None] > 0.0)).astype(jnp.float32)
    mask_ref = dist_ref < CUT_DIST_BOHR

    assert jnp.allclose(dist[..., 0], dist_ref, atol=1e-5)
    assert jnp.allclose(direction, dir_ref, atol=1e-4)
    assert bool(jnp.all(mask[..., 0] == mask_ref))
    assert jnp.allclose(expansion, exp_ref, atol=5e-4)

    print("KERNEL_OK")
</pallas_src>

<mosaic_0001>
module attributes {stable_mosaic.version = 11 : i64} {
  func.func @_expansion_kernel(%arg0: i32, %arg1: i32, %arg2: i32, %arg3: memref<1x32x3xf32, #tpu.memory_space<vmem>>, %arg4: memref<1x3x128xf32, #tpu.memory_space<vmem>>, %arg5: memref<1x32x128xf32, #tpu.memory_space<vmem>>, %arg6: memref<1x3x32x128xf32, #tpu.memory_space<vmem>>, %arg7: memref<1x20x32x128xf32, #tpu.memory_space<vmem>>) attributes {dimension_semantics = [#tpu.dimension_semantics<parallel>, #tpu.dimension_semantics<parallel>, #tpu.dimension_semantics<arbitrary>], iteration_bounds = array<i64: 2, 2, 2>, scalar_prefetch = 0 : i64, scratch_operands = 0 : i64, tpu.core_type = #tpu.core_type<tc>, window_params = [{transform_indices = @transform_0, window_bounds = array<i64: 1, 32, 3>}, {transform_indices = @transform_1, window_bounds = array<i64: 1, 3, 128>}, {transform_indices = @transform_2, window_bounds = array<i64: 1, 32, 128>}, {transform_indices = @transform_3, window_bounds = array<i64: 1, 3, 32, 128>}, {transform_indices = @transform_4, window_bounds = array<i64: 1, 20, 32, 128>}]} {
    %c0 = arith.constant 0 : index
    %c0_0 = arith.constant 0 : index
    %c0_1 = arith.constant 0 : index
    %0 = vector.load %arg3[%c0, %c0_0, %c0_1] : memref<1x32x3xf32, #tpu.memory_space<vmem>>, vector<1x32x1xf32>
    %1 = vector.shape_cast %0 : vector<1x32x1xf32> to vector<32x1xf32>
    %c0_2 = arith.constant 0 : index
    %c0_3 = arith.constant 0 : index
    %c1 = arith.constant 1 : index
    %2 = vector.load %arg3[%c0_2, %c0_3, %c1] : memref<1x32x3xf32, #tpu.memory_space<vmem>>, vector<1x32x1xf32>
    %3 = vector.shape_cast %2 : vector<1x32x1xf32> to vector<32x1xf32>
    %c0_4 = arith.constant 0 : index
    %c0_5 = arith.constant 0 : index
    %c2 = arith.constant 2 : index
    %4 = vector.load %arg3[%c0_4, %c0_5, %c2] : memref<1x32x3xf32, #tpu.memory_space<vmem>>, vector<1x32x1xf32>
    %5 = vector.shape_cast %4 : vector<1x32x1xf32> to vector<32x1xf32>
    %c0_6 = arith.constant 0 : index
    %c0_7 = arith.constant 0 : index
    %c0_8 = arith.constant 0 : index
    %6 = vector.load %arg4[%c0_6, %c0_7, %c0_8] : memref<1x3x128xf32, #tpu.memory_space<vmem>>, vector<1x1x128xf32>
    %7 = vector.shape_cast %6 : vector<1x1x128xf32> to vector<1x128xf32>
    %c0_9 = arith.constant 0 : index
    %c1_10 = arith.constant 1 : index
    %c0_11 = arith.constant 0 : index
    %8 = vector.load %arg4[%c0_9, %c1_10, %c0_11] : memref<1x3x128xf32, #tpu.memory_space<vmem>>, vector<1x1x128xf32>
    %9 = vector.shape_cast %8 : vector<1x1x128xf32> to vector<1x128xf32>
    %c0_12 = arith.constant 0 : index
    %c2_13 = arith.constant 2 : index
    %c0_14 = arith.constant 0 : index
    %10 = vector.load %arg4[%c0_12, %c2_13, %c0_14] : memref<1x3x128xf32, #tpu.memory_space<vmem>>, vector<1x1x128xf32>
    %11 = vector.shape_cast %10 : vector<1x1x128xf32> to vector<1x128xf32>
    %12 = vector.broadcast %1 : vector<32x1xf32> to vector<32x128xf32>
    %13 = vector.broadcast %7 : vector<1x128xf32> to vector<32x128xf32>
    %14 = arith.subf %12, %13 : vector<32x128xf32>
    %15 = vector.broadcast %3 : vector<32x1xf32> to vector<32x128xf32>
    %16 = vector.broadcast %9 : vector<1x128xf32> to vector<32x128xf32>
    %17 = arith.subf %15, %16 : vector<32x128xf32>
    %18 = vector.broadcast %5 : vector<32x1xf32> to vector<32x128xf32>
    %19 = vector.broadcast %11 : vector<1x128xf32> to vector<32x128xf32>
    %20 = arith.subf %18, %19 : vector<32x128xf32>
    %21 = arith.mulf %14, %14 : vector<32x128xf32>
    %22 = arith.mulf %17, %17 : vector<32x128xf32>
    %23 = arith.addf %21, %22 : vector<32x128xf32>
    %24 = arith.mulf %20, %20 : vector<32x128xf32>
    %25 = arith.addf %23, %24 : vector<32x128xf32>
    %26 = math.sqrt %25 : vector<32x128xf32>
    %cst = arith.constant 0.000000e+00 : f32
    %27 = vector.broadcast %cst : f32 to vector<32x128xf32>
    %28 = arith.cmpf ogt, %25, %27 : vector<32x128xf32>
    %cst_15 = arith.constant 1.000000e+00 : f32
    %29 = vector.broadcast %cst_15 : f32 to vector<32x128xf32>
    %30 = arith.divf %29, %26 : vector<32x128xf32>
    %cst_16 = arith.constant 0.000000e+00 : f32
    %31 = vector.broadcast %cst_16 : f32 to vector<32x128xf32>
    %32 = arith.select %28, %30, %31 : vector<32x128xi1>, vector<32x128xf32>
    %c0_17 = arith.constant 0 : index
    %c0_18 = arith.constant 0 : index
    %c0_19 = arith.constant 0 : index
    %33 = vector.load %arg5[%c0_17, %c0_18, %c0_19] : memref<1x32x128xf32, #tpu.memory_space<vmem>>, vector<1x32x128xf32>
    %34 = vector.shape_cast %33 : vector<1x32x128xf32> to vector<32x128xf32>
    %35 = vector.shape_cast %26 : vector<32x128xf32> to vector<1x32x128xf32>
    tpu.vector_store %arg5[%c0_17, %c0_18, %c0_19], %35 {strides = array<i32>} : memref<1x32x128xf32, #tpu.memory_space<vmem>>, vector<1x32x128xf32>,
    %36 = arith.mulf %14, %32 : vector<32x128xf32>
    %c0_20 = arith.constant 0 : index
    %c0_21 = arith.constant 0 : index
    %c0_22 = arith.constant 0 : index
    %c0_23 = arith.constant 0 : index
    %37 = vector.load %arg6[%c0_20, %c0_21, %c0_22, %c0_23] : memref<1x3x32x128xf32, #tpu.memory_space<vmem>>, vector<1x1x32x128xf32>
    %38 = vector.shape_cast %37 : vector<1x1x32x128xf32> to vector<32x128xf32>
    %39 = vector.shape_cast %36 : vector<32x128xf32> to vector<1x1x32x128xf32>
    tpu.vector_store %arg6[%c0_20, %c0_21, %c0_22, %c0_23], %39 {strides = array<i32>} : memref<1x3x32x128xf32, #tpu.memory_space<vmem>>, vector<1x1x32x128xf32>,
    %40 = arith.mulf %17, %32 : vector<32x128xf32>
    %c0_24 = arith.constant 0 : index
    %c1_25 = arith.constant 1 : index
    %c0_26 = arith.constant 0 : index
    %c0_27 = arith.constant 0 : index
    %41 = vector.load %arg6[%c0_24, %c1_25, %c0_26, %c0_27] : memref<1x3x32x128xf32, #tpu.memory_space<vmem>>, vector<1x1x32x128xf32>
    %42 = vector.shape_cast %41 : vector<1x1x32x128xf32> to vector<32x128xf32>
    %43 = vector.shape_cast %40 : vector<32x128xf32> to vector<1x1x32x128xf32>
    tpu.vector_store %arg6[%c0_24, %c1_25, %c0_26, %c0_27], %43 {strides = array<i32>} : memref<1x3x32x128xf32, #tpu.memory_space<vmem>>, vector<1x1x32x128xf32>,
    %44 = arith.mulf %20, %32 : vector<32x128xf32>
    %c0_28 = arith.constant 0 : index
    %c2_29 = arith.constant 2 : index
    %c0_30 = arith.constant 0 : index
    %c0_31 = arith.constant 0 : index
    %45 = vector.load %arg6[%c0_28, %c2_29, %c0_30, %c0_31] : memref<1x3x32x128xf32, #tpu.memory_space<vmem>>, vector<1x1x32x128xf32>
    %46 = vector.shape_cast %45 : vector<1x1x32x128xf32> to vector<32x128xf32>
    %47 = vector.shape_cast %44 : vector<32x128xf32> to vector<1x1x32x128xf32>
    tpu.vector_store %arg6[%c0_28, %c2_29, %c0_30, %c0_31], %47 {strides = array<i32>} : memref<1x3x32x128xf32, #tpu.memory_space<vmem>>, vector<1x1x32x128xf32>,
    %cst_32 = arith.constant 9.99999996E-12 : f32
    %48 = vector.broadcast %cst_32 : f32 to vector<32x128xf32>
    %49 = arith.addf %26, %48 : vector<32x128xf32>
    %cst_33 = arith.constant -5.000000e-01 : f32
    %50 = vector.broadcast %cst_33 : f32 to vector<32x128xf32>
    %51 = arith.subf %49, %50 : vector<32x128xf32>
    %cst_34 = arith.constant 3.500000e+00 : f32
    %52 = vector.broadcast %cst_34 : f32 to vector<32x128xf32>
    %53 = arith.cmpf olt, %51, %52 : vector<32x128xf32>
    %cst_35 = arith.constant 0.000000e+00 : f32
    %54 = vector.broadcast %cst_35 : f32 to vector<32x128xf32>
    %55 = arith.cmpf ogt, %51, %54 : vector<32x128xf32>
    %56 = arith.andi %53, %55 : vector<32x128xi1>
    %57 = arith.extui %56 : vector<32x128xi1> to vector<32x128xi32>
    %58 = arith.sitofp %57 : vector<32x128xi32> to vector<32x128xf32>
    %cst_36 = arith.constant 0.755928933 : f32
    %59 = vector.broadcast %cst_36 : f32 to vector<32x128xf32>
    %60 = arith.mulf %59, %58 : vector<32x128xf32>
    %61 = tpu.reciprocal %51 : vector<32x128xf32> -> vector<32x128xf32>
    %62 = arith.mulf %60, %61 : vector<32x128xf32>
    %cst_37 = arith.constant 0.897597908 : f32
    %63 = vector.broadcast %cst_37 : f32 to vector<32x128xf32>
    %64 = arith.mulf %63, %51 : vector<32x128xf32>
    %65 = math.sin %64 : vector<32x128xf32>
    %66 = math.cos %64 : vector<32x128xf32>
    %cst_38 = arith.constant 2.000000e+00 : f32
    %67 = vector.broadcast %cst_38 : f32 to vector<32x128xf32>
    %68 = arith.mulf %67, %66 : vector<32x128xf32>
    %cst_39 = arith.constant 0.000000e+00 : f32
    %69 = vector.broadcast %cst_39 : f32 to vector<32x128xf32>
    %70 = arith.mulf %62, %65 : vector<32x128xf32>
    %c0_40 = arith.constant 0 : index
    %c0_41 = arith.constant 0 : index
    %c0_42 = arith.constant 0 : index
    %c0_43 = arith.constant 0 : index
    %71 = vector.load %arg7[%c0_40, %c0_41, %c0_42, %c0_43] : memref<1x20x32x128xf32, #tpu.memory_space<vmem>>, vector<1x1x32x128xf32>
    %72 = vector.shape_cast %71 : vector<1x1x32x128xf32> to vector<32x128xf32>
    %73 = vector.shape_cast %70 : vector<32x128xf32> to vector<1x1x32x128xf32>
    tpu.vector_store %arg7[%c0_40, %c0_41, %c0_42, %c0_43], %73 {strides = array<i32>} : memref<1x20x32x128xf32, #tpu.memory_space<vmem>>, vector<1x1x32x128xf32>,
    %74 = arith.mulf %68, %65 : vector<32x128xf32>
    %75 = arith.subf %74, %69 : vector<32x128xf32>
    %76 = arith.mulf %62, %75 : vector<32x128xf32>
    %c0_44 = arith.constant 0 : index
    %c1_45 = arith.constant 1 : index
    %c0_46 = arith.constant 0 : index
    %c0_47 = arith.constant 0 : index
    %77 = vector.load %arg7[%c0_44, %c1_45, %c0_46, %c0_47] : memref<1x20x32x128xf32, #tpu.memory_space<vmem>>, vector<1x1x32x128xf32>
    %78 = vector.shape_cast %77 : vector<1x1x32x128xf32> to vector<32x128xf32>
    %79 = vector.shape_cast %76 : vector<32x128xf32> to vector<1x1x32x128xf32>
    tpu.vector_store %arg7[%c0_44, %c1_45, %c0_46, %c0_47], %79 {strides = array<i32>} : memref<1x20x32x128xf32, #tpu.memory_space<vmem>>, vector<1x1x32x128xf32>,
    %80 = arith.mulf %68, %75 : vector<32x128xf32>
    %81 = arith.subf %80, %65 : vector<32x128xf32>
    %82 = arith.mulf %62, %81 : vector<32x128xf32>
    %c0_48 = arith.constant 0 : index
    %c2_49 = arith.constant 2 : index
    %c0_50 = arith.constant 0 : index
    %c0_51 = arith.constant 0 : index
    %83 = vector.load %arg7[%c0_48, %c2_49, %c0_50, %c0_51] : memref<1x20x32x128xf32, #tpu.memory_space<vmem>>, vector<1x1x32x128xf32>
    %84 = vector.shape_cast %83 : vector<1x1x32x128xf32> to vector<32x128xf32>
    %85 = vector.shape_cast %82 : vector<32x128xf32> to vector<1x1x32x128xf32>
    tpu.vector_store %arg7[%c0_48, %c2_49, %c0_50, %c0_51], %85 {strides = array<i32>} : memref<1x20x32x128xf32, #tpu.memory_space<vmem>>, vector<1x1x32x128xf32>,
    %86 = arith.mulf %68, %81 : vector<32x128xf32>
    %87 = arith.subf %86, %75 : vector<32x128xf32>
    %88 = arith.mulf %62, %87 : vector<32x128xf32>
    %c0_52 = arith.constant 0 : index
    %c3 = arith.constant 3 : index
    %c0_53 = arith.constant 0 : index
    %c0_54 = arith.constant 0 : index
    %89 = vector.load %arg7[%c0_52, %c3, %c0_53, %c0_54] : memref<1x20x32x128xf32, #tpu.memory_space<vmem>>, vector<1x1x32x128xf32>
    %90 = vector.shape_cast %89 : vector<1x1x32x128xf32> to vector<32x128xf32>
    %91 = vector.shape_cast %88 : vector<32x128xf32> to vector<1x1x32x128xf32>
    tpu.vector_store %arg7[%c0_52, %c3, %c0_53, %c0_54], %91 {strides = array<i32>} : memref<1x20x32x128xf32, #tpu.memory_space<vmem>>, vector<1x1x32x128xf32>,
    %92 = arith.mulf %68, %87 : vector<32x128xf32>
    %93 = arith.subf %92, %81 : vector<32x128xf32>
    %94 = arith.mulf %62, %93 : vector<32x128xf32>
    %c0_55 = arith.constant 0 : index
    %c4 = arith.constant 4 : index
    %c0_56 = arith.constant 0 : index
    %c0_57 = arith.constant 0 : index
    %95 = vector.load %arg7[%c0_55, %c4, %c0_56, %c0_57] : memref<1x20x32x128xf32, #tpu.memory_space<vmem>>, vector<1x1x32x128xf32>
    %96 = vector.shape_cast %95 : vector<1x1x32x128xf32> to vector<32x128xf32>
    %97 = vector.shape_cast %94 : vector<32x128xf32> to vector<1x1x32x128xf32>
    tpu.vector_store %arg7[%c0_55, %c4, %c0_56, %c0_57], %97 {strides = array<i32>} : memref<1x20x32x128xf32, #tpu.memory_space<vmem>>, vector<1x1x32x128xf32>,
    %98 = arith.mulf %68, %93 : vector<32x128xf32>
    %99 = arith.subf %98, %87 : vector<32x128xf32>
    %100 = arith.mulf %62, %99 : vector<32x128xf32>
    %c0_58 = arith.constant 0 : index
    %c5 = arith.constant 5 : index
    %c0_59 = arith.constant 0 : index
    %c0_60 = arith.constant 0 : index
    %101 = vector.load %arg7[%c0_58, %c5, %c0_59, %c0_60] : memref<1x20x32x128xf32, #tpu.memory_space<vmem>>, vector<1x1x32x128xf32>
    %102 = vector.shape_cast %101 : vector<1x1x32x128xf32> to vector<32x128xf32>
    %103 = vector.shape_cast %100 : vector<32x128xf32> to vector<1x1x32x128xf32>
    tpu.vector_store %arg7[%c0_58, %c5, %c0_59, %c0_60], %103 {strides = array<i32>} : memref<1x20x32x128xf32, #tpu.memory_space<vmem>>, vector<1x1x32x128xf32>,
    %104 = arith.mulf %68, %99 : vector<32x128xf32>
    %105 = arith.subf %104, %93 : vector<32x128xf32>
    %106 = arith.mulf %62, %105 : vector<32x128xf32>
    %c0_61 = arith.constant 0 : index
    %c6 = arith.constant 6 : index
    %c0_62 = arith.constant 0 : index
    %c0_63 = arith.constant 0 : index
    %107 = vector.load %arg7[%c0_61, %c6, %c0_62, %c0_63] : memref<1x20x32x128xf32, #tpu.memory_space<vmem>>, vector<1x1x32x128xf32>
    %108 = vector.shape_cast %107 : vector<1x1x32x128xf32> to vector<32x128xf32>
    %109 = vector.shape_cast %106 : vector<32x128xf32> to vector<1x1x32x128xf32>
    tpu.vector_store %arg7[%c0_61, %c6, %c0_62, %c0_63], %109 {strides = array<i32>} : memref<1x20x32x128xf32, #tpu.memory_space<vmem>>, vector<1x1x32x128xf32>,
    %110 = arith.mulf %68, %105 : vector<32x128xf32>
    %111 = arith.subf %110, %99 : vector<32x128xf32>
    %112 = arith.mulf %62, %111 : vector<32x128xf32>
    %c0_64 = arith.constant 0 : index
    %c7 = arith.constant 7 : index
    %c0_65 = arith.constant 0 : index
    %c0_66 = arith.constant 0 : index
    %113 = vector.load %arg7[%c0_64, %c7, %c0_65, %c0_66] : memref<1x20x32x128xf32, #tpu.memory_space<vmem>>, vector<1x1x32x128xf32>
    %114 = vector.shape_cast %113 : vector<1x1x32x128xf32> to vector<32x128xf32>
    %115 = vector.shape_cast %112 : vector<32x128xf32> to vector<1x1x32x128xf32>
    tpu.vector_store %arg7[%c0_64, %c7, %c0_65, %c0_66], %115 {strides = array<i32>} : memref<1x20x32x128xf32, #tpu.memory_space<vmem>>, vector<1x1x32x128xf32>,
    %116 = arith.mulf %68, %111 : vector<32x128xf32>
    %117 = arith.subf %116, %105 : vector<32x128xf32>
    %118 = arith.mulf %62, %117 : vector<32x128xf32>
    %c0_67 = arith.constant 0 : index
    %c8 = arith.constant 8 : index
    %c0_68 = arith.constant 0 : index
    %c0_69 = arith.constant 0 : index
    %119 = vector.load %arg7[%c0_67, %c8, %c0_68, %c0_69] : memref<1x20x32x128xf32, #tpu.memory_space<vmem>>, vector<1x1x32x128xf32>
    %120 = vector.shape_cast %119 : vector<1x1x32x128xf32> to vector<32x128xf32>
    %121 = vector.shape_cast %118 : vector<32x128xf32> to vector<1x1x32x128xf32>
    tpu.vector_store %arg7[%c0_67, %c8, %c0_68, %c0_69], %121 {strides = array<i32>} : memref<1x20x32x128xf32, #tpu.memory_space<vmem>>, vector<1x1x32x128xf32>,
    %122 = arith.mulf %68, %117 : vector<32x128xf32>
    %123 = arith.subf %122, %111 : vector<32x128xf32>
    %124 = arith.mulf %62, %123 : vector<32x128xf32>
    %c0_70 = arith.constant 0 : index
    %c9 = arith.constant 9 : index
    %c0_71 = arith.constant 0 : index
    %c0_72 = arith.constant 0 : index
    %125 = vector.load %arg7[%c0_70, %c9, %c0_71, %c0_72] : memref<1x20x32x128xf32, #tpu.memory_space<vmem>>, vector<1x1x32x128xf32>
    %126 = vector.shape_cast %125 : vector<1x1x32x128xf32> to vector<32x128xf32>
    %127 = vector.shape_cast %124 : vector<32x128xf32> to vector<1x1x32x128xf32>
    tpu.vector_store %arg7[%c0_70, %c9, %c0_71, %c0_72], %127 {strides = array<i32>} : memref<1x20x32x128xf32, #tpu.memory_space<vmem>>, vector<1x1x32x128xf32>,
    %128 = arith.mulf %68, %123 : vector<32x128xf32>
    %129 = arith.subf %128, %117 : vector<32x128xf32>
    %130 = arith.mulf %62, %129 : vector<32x128xf32>
    %c0_73 = arith.constant 0 : index
    %c10 = arith.constant 10 : index
    %c0_74 = arith.constant 0 : index
    %c0_75 = arith.constant 0 : index
    %131 = vector.load %arg7[%c0_73, %c10, %c0_74, %c0_75] : memref<1x20x32x128xf32, #tpu.memory_space<vmem>>, vector<1x1x32x128xf32>
    %132 = vector.shape_cast %131 : vector<1x1x32x128xf32> to vector<32x128xf32>
    %133 = vector.shape_cast %130 : vector<32x128xf32> to vector<1x1x32x128xf32>
    tpu.vector_store %arg7[%c0_73, %c10, %c0_74, %c0_75], %133 {strides = array<i32>} : memref<1x20x32x128xf32, #tpu.memory_space<vmem>>, vector<1x1x32x128xf32>,
    %134 = arith.mulf %68, %129 : vector<32x128xf32>
    %135 = arith.subf %134, %123 : vector<32x128xf32>
    %136 = arith.mulf %62, %135 : vector<32x128xf32>
    %c0_76 = arith.constant 0 : index
    %c11 = arith.constant 11 : index
    %c0_77 = arith.constant 0 : index
    %c0_78 = arith.constant 0 : index
    %137 = vector.load %arg7[%c0_76, %c11, %c0_77, %c0_78] : memref<1x20x32x128xf32, #tpu.memory_space<vmem>>, vector<1x1x32x128xf32>
    %138 = vector.shape_cast %137 : vector<1x1x32x128xf32> to vector<32x128xf32>
    %139 = vector.shape_cast %136 : vector<32x128xf32> to vector<1x1x32x128xf32>
    tpu.vector_store %arg7[%c0_76, %c11, %c0_77, %c0_78], %139 {strides = array<i32>} : memref<1x20x32x128xf32, #tpu.memory_space<vmem>>, vector<1x1x32x128xf32>,
    %140 = arith.mulf %68, %135 : vector<32x128xf32>
    %141 = arith.subf %140, %129 : vector<32x128xf32>
    %142 = arith.mulf %62, %141 : vector<32x128xf32>
    %c0_79 = arith.constant 0 : index
    %c12 = arith.constant 12 : index
    %c0_80 = arith.constant 0 : index
    %c0_81 = arith.constant 0 : index
    %143 = vector.load %arg7[%c0_79, %c12, %c0_80, %c0_81] : memref<1x20x32x128xf32, #tpu.memory_space<vmem>>, vector<1x1x32x128xf32>
    %144 = vector.shape_cast %143 : vector<1x1x32x128xf32> to vector<32x128xf32>
    %145 = vector.shape_cast %142 : vector<32x128xf32> to vector<1x1x32x128xf32>
    tpu.vector_store %arg7[%c0_79, %c12, %c0_80, %c0_81], %145 {strides = array<i32>} : memref<1x20x32x128xf32, #tpu.memory_space<vmem>>, vector<1x1x32x128xf32>,
    %146 = arith.mulf %68, %141 : vector<32x128xf32>
    %147 = arith.subf %146, %135 : vector<32x128xf32>
    %148 = arith.mulf %62, %147 : vector<32x128xf32>
    %c0_82 = arith.constant 0 : index
    %c13 = arith.constant 13 : index
    %c0_83 = arith.constant 0 : index
    %c0_84 = arith.constant 0 : index
    %149 = vector.load %arg7[%c0_82, %c13, %c0_83, %c0_84] : memref<1x20x32x128xf32, #tpu.memory_space<vmem>>, vector<1x1x32x128xf32>
    %150 = vector.shape_cast %149 : vector<1x1x32x128xf32> to vector<32x128xf32>
    %151 = vector.shape_cast %148 : vector<32x128xf32> to vector<1x1x32x128xf32>
    tpu.vector_store %arg7[%c0_82, %c13, %c0_83, %c0_84], %151 {strides = array<i32>} : memref<1x20x32x128xf32, #tpu.memory_space<vmem>>, vector<1x1x32x128xf32>,
    %152 = arith.mulf %68, %147 : vector<32x128xf32>
    %153 = arith.subf %152, %141 : vector<32x128xf32>
    %154 = arith.mulf %62, %153 : vector<32x128xf32>
    %c0_85 = arith.constant 0 : index
    %c14 = arith.constant 14 : index
    %c0_86 = arith.constant 0 : index
    %c0_87 = arith.constant 0 : index
    %155 = vector.load %arg7[%c0_85, %c14, %c0_86, %c0_87] : memref<1x20x32x128xf32, #tpu.memory_space<vmem>>, vector<1x1x32x128xf32>
    %156 = vector.shape_cast %155 : vector<1x1x32x128xf32> to vector<32x128xf32>
    %157 = vector.shape_cast %154 : vector<32x128xf32> to vector<1x1x32x128xf32>
    tpu.vector_store %arg7[%c0_85, %c14, %c0_86, %c0_87], %157 {strides = array<i32>} : memref<1x20x32x128xf32, #tpu.memory_space<vmem>>, vector<1x1x32x128xf32>,
    %158 = arith.mulf %68, %153 : vector<32x128xf32>
    %159 = arith.subf %158, %147 : vector<32x128xf32>
    %160 = arith.mulf %62, %159 : vector<32x128xf32>
    %c0_88 = arith.constant 0 : index
    %c15 = arith.constant 15 : index
    %c0_89 = arith.constant 0 : index
    %c0_90 = arith.constant 0 : index
    %161 = vector.load %arg7[%c0_88, %c15, %c0_89, %c0_90] : memref<1x20x32x128xf32, #tpu.memory_space<vmem>>, vector<1x1x32x128xf32>
    %162 = vector.shape_cast %161 : vector<1x1x32x128xf32> to vector<32x128xf32>
    %163 = vector.shape_cast %160 : vector<32x128xf32> to vector<1x1x32x128xf32>
    tpu.vector_store %arg7[%c0_88, %c15, %c0_89, %c0_90], %163 {strides = array<i32>} : memref<1x20x32x128xf32, #tpu.memory_space<vmem>>, vector<1x1x32x128xf32>,
    %164 = arith.mulf %68, %159 : vector<32x128xf32>
    %165 = arith.subf %164, %153 : vector<32x128xf32>
    %166 = arith.mulf %62, %165 : vector<32x128xf32>
    %c0_91 = arith.constant 0 : index
    %c16 = arith.constant 16 : index
    %c0_92 = arith.constant 0 : index
    %c0_93 = arith.constant 0 : index
    %167 = vector.load %arg7[%c0_91, %c16, %c0_92, %c0_93] : memref<1x20x32x128xf32, #tpu.memory_space<vmem>>, vector<1x1x32x128xf32>
    %168 = vector.shape_cast %167 : vector<1x1x32x128xf32> to vector<32x128xf32>
    %169 = vector.shape_cast %166 : vector<32x128xf32> to vector<1x1x32x128xf32>
    tpu.vector_store %arg7[%c0_91, %c16, %c0_92, %c0_93], %169 {strides = array<i32>} : memref<1x20x32x128xf32, #tpu.memory_space<vmem>>, vector<1x1x32x128xf32>,
    %170 = arith.mulf %68, %165 : vector<32x128xf32>
    %171 = arith.subf %170, %159 : vector<32x128xf32>
    %172 = arith.mulf %62, %171 : vector<32x128xf32>
    %c0_94 = arith.constant 0 : index
    %c17 = arith.constant 17 : index
    %c0_95 = arith.constant 0 : index
    %c0_96 = arith.constant 0 : index
    %173 = vector.load %arg7[%c0_94, %c17, %c0_95, %c0_96] : memref<1x20x32x128xf32, #tpu.memory_space<vmem>>, vector<1x1x32x128xf32>
    %174 = vector.shape_cast %173 : vector<1x1x32x128xf32> to vector<32x128xf32>
    %175 = vector.shape_cast %172 : vector<32x128xf32> to vector<1x1x32x128xf32>
    tpu.vector_store %arg7[%c0_94, %c17, %c0_95, %c0_96], %175 {strides = array<i32>} : memref<1x20x32x128xf32, #tpu.memory_space<vmem>>, vector<1x1x32x128xf32>,
    %176 = arith.mulf %68, %171 : vector<32x128xf32>
    %177 = arith.subf %176, %165 : vector<32x128xf32>
    %178 = arith.mulf %62, %177 : vector<32x128xf32>
    %c0_97 = arith.constant 0 : index
    %c18 = arith.constant 18 : index
    %c0_98 = arith.constant 0 : index
    %c0_99 = arith.constant 0 : index
    %179 = vector.load %arg7[%c0_97, %c18, %c0_98, %c0_99] : memref<1x20x32x128xf32, #tpu.memory_space<vmem>>, vector<1x1x32x128xf32>
    %180 = vector.shape_cast %179 : vector<1x1x32x128xf32> to vector<32x128xf32>
    %181 = vector.shape_cast %178 : vector<32x128xf32> to vector<1x1x32x128xf32>
    tpu.vector_store %arg7[%c0_97, %c18, %c0_98, %c0_99], %181 {strides = array<i32>} : memref<1x20x32x128xf32, #tpu.memory_space<vmem>>, vector<1x1x32x128xf32>,
    %182 = arith.mulf %68, %177 : vector<32x128xf32>
    %183 = arith.subf %182, %171 : vector<32x128xf32>
    %184 = arith.mulf %62, %183 : vector<32x128xf32>
    %c0_100 = arith.constant 0 : index
    %c19 = arith.constant 19 : index
    %c0_101 = arith.constant 0 : index
    %c0_102 = arith.constant 0 : index
    %185 = vector.load %arg7[%c0_100, %c19, %c0_101, %c0_102] : memref<1x20x32x128xf32, #tpu.memory_space<vmem>>, vector<1x1x32x128xf32>
    %186 = vector.shape_cast %185 : vector<1x1x32x128xf32> to vector<32x128xf32>
    %187 = vector.shape_cast %184 : vector<32x128xf32> to vector<1x1x32x128xf32>
    tpu.vector_store %arg7[%c0_100, %c19, %c0_101, %c0_102], %187 {strides = array<i32>} : memref<1x20x32x128xf32, #tpu.memory_space<vmem>>, vector<1x1x32x128xf32>,
    return
  }
  func.func @transform_0(%arg0: i32, %arg1: i32, %arg2: i32) -> (i32, i32, i32) {
    %c0_i32 = arith.constant 0 : i32
    %c0_i32_0 = arith.constant 0 : i32
    return %arg0, %arg1, %c0_i32 : i32, i32, i32
  }
  func.func @transform_1(%arg0: i32, %arg1: i32, %arg2: i32) -> (i32, i32, i32) {
    %c0_i32 = arith.constant 0 : i32
    %c0_i32_0 = arith.constant 0 : i32
    return %arg0, %c0_i32, %arg2 : i32, i32, i32
  }
  func.func @transform_2(%arg0: i32, %arg1: i32, %arg2: i32) -> (i32, i32, i32) {
    %c0_i32 = arith.constant 0 : i32
    return %arg0, %arg1, %arg2 : i32, i32, i32
  }
  func.func @transform_3(%arg0: i32, %arg1: i32, %arg2: i32) -> (i32, i32, i32, i32) {
    %c0_i32 = arith.constant 0 : i32
    %c0_i32_0 = arith.constant 0 : i32
    return %arg0, %c0_i32, %arg1, %arg2 : i32, i32, i32, i32
  }
  func.func @transform_4(%arg0: i32, %arg1: i32, %arg2: i32) -> (i32, i32, i32, i32) {
    %c0_i32 = arith.constant 0 : i32
    %c0_i32_0 = arith.constant 0 : i32
    return %arg0, %c0_i32, %arg1, %arg2 : i32, i32, i32, i32
  }
}

</mosaic_0001>

<bundles_post_ra>
// kernel: tpu_custom_call.1
= control target key start
LH: loop header
LB: loop body
LE: loop exit
PB: predicated region body
PF: predicated region fallthrough
CT: control target
= control target key end

     0   :  { %10 = vsyncpa [#allocation3], 0  ;;  %s4256_s0 = inlined_call_operand.vmem [shape: f32[2,64,3], index: 0, kind: input, shape index: {}]   ;;  %s4257_s1 = inlined_call_operand.vmem [shape: f32[2,3,256], index: 1, kind: input, shape index: {}]   ;;  %s4258_s2 = inlined_call_operand.hbm [shape: f32[2,64,256], index: 2, kind: output, shape index: {0}]   ;;  %s4259_s3 = inlined_call_operand.hbm [shape: f32[2,3,64,256], index: 3, kind: output, shape index: {1}]   ;;  %s4260_s4 = inlined_call_operand.hbm [shape: f32[2,20,64,256], index: 4, kind: output, shape index: {2}]  }
   0x1   :  { %12 = vsyncpa [#allocation3 + $0x1], 0 }
   0x2   :  { %13 = vsyncpa [#allocation5], 0 }
   0x3   :  { %15 = vsyncpa [#allocation5 + $0x1], 0  ;;  %s2984_s15 = smov 0   ;;  %s2986_s16 = smov 0  }
   0x4   :  { %s2988_s17 = smov 0   ;;  %s2990_s18 = smov 0  }
   0x5   :  { %s2992_s19 = smov 0   ;;  %s2994_s20 = smov 0  }
   0x6   :  { %s2996_s21 = smov 0   ;;  %s2998_s22 = smov 0  }
   0x7   :  { %s3000_s23 = smov 0   ;;  %s3002_s24 = smov 0  }
   0x8 LB: > { %4268 = sst [smem:[#allocation13_spill]] %s2920_s22  ;;  %s4262_s25 = sadd.s32 4294967295, %s2928_s24   ;;  %s2928_s24 = sphi %s3002_s24, %s21_s24   ;;  %s2924_s23 = sphi %s3000_s23, %s4301_s23   ;;  %s2920_s22 = sphi %s2998_s22, %s4300_s22   ;;  %s2916_s21 = sphi %s2996_s21, %s4306_s21   ;;  %s2912_s20 = sphi %s2994_s20, %s4298_s20   ;;  %s2908_s19 = sphi %s2992_s19, %s4297_s19   ;;  %s2904_s18 = sphi %s2990_s18, %s4305_s18   ;;  %s2900_s17 = sphi %s2988_s17, %s4304_s17   ;;  %s2896_s16 = sphi %s2986_s16, %s4303_s16   ;;  %s2892_s15 = sphi %s2984_s15, %s4302_s15  }
   0x9   : > { %4269 = sst [smem:[#allocation14_spill]] %s2924_s23  ;;  %s33_s26 = sadd.s32 1, %s2916_s21 }
   0xa   : > { %p34_p0 = scmp.ge.s32.totalorder %s33_s26, 2  ;;  %s36_s27 = sadd.s32 1, %s2920_s22 }
   0xb   : > { %s4261_s28 = sadd.s32 4294967294, %s2928_s24   ;;  %p117_p1 = scmp.ne.s32.totalorder %s2900_s17, %s2896_s16 }
   0xc   : > { %s4308_s26 = smov (%p34_p0, %s33_s26), 0  ;;  %s4310_s27 = smov (!%p34_p0, %s36_s27), %s2920_s22 }
   0xd   : > { %4270 = sst [smem:[#allocation15_spill]] %s4308_s26  ;;  %s40_s29 = sadd.s32 1, %s2924_s23 }
   0xe   : > { %p118_p2 = scmp.eq.s32.totalorder %s4262_s25, 7  ;;  %p38_p3 = scmp.ge.s32.totalorder %s4310_s27, 2 }
   0xf   : > { %p123_p4 = scmp.ne.s32.totalorder %s2896_s16, %s2892_s15  ;;  %p124_p6 = scmp.eq.s32.totalorder %s4261_s28, 7 }
  0x10   : > { %p3048_p5 = por %p118_p2, %p117_p1  ;;  %s4312_s27 = smov (%p38_p3, %s4310_s27), 0 }
  0x11   : > { %4272 = sst [smem:[#allocation16_spill]] %s4312_s27  ;;  %s4314_s29 = smov (!%p38_p3, %s40_s29), %s2924_s23 }
  0x12   : > { %p3057_p7 = por %p124_p6, %p123_p4  ;;  %p42_p8 = scmp.ge.s32.totalorder %s4314_s29, 2 }
  0x13   : > { %p2498_p9 = scmp.ge.s32.totalorder %s2928_s24, 1  ;;  %s101_s6 = ssub.s32 %s2920_s22, %s4312_s27 }
  0x14   : > { %p226_p10 = scmp.lt.s32.totalorder %s2928_s24, 9  ;;  %s4316_s29 = smov (%p42_p8, %s4314_s29), 0 }
  0x15   : > { %4274 = sst [smem:[#allocation17_spill]] %s4316_s29  ;;  %s103_s7 = ssub.s32 %s2916_s21, %s4308_s26 }
  0x16   : > { %p227_p11 = pnand %p2498_p9, %p226_p10  ;;  %s100_s8 = ssub.s32 %s2924_s23, %s4316_s29 }
  0x17   : > { %s102_s9 = sor.u32 %s101_s6, %s100_s8  ;;  %s107_s11 = sadd.s32 1, %s2900_s17 }
  0x18   : > { %s104_s10 = sor.u32 %s103_s7, %s102_s9  ;;  %230 = sbr.rel (%p227_p11) target bundleno = 571 (0x23b), region = 28 }
  0x19   : > { %p105_p12 = scmp.eq.s32.totalorder %s104_s10, 0  ;;  %s2500_s13 = sshll.u32 (!%p227_p11), %s2908_s19, 2 }
  0x1a   : > { %p275_p13 = scmp.lt.s32.totalorder (!%p227_p11), %s2912_s20, 1  ;;  %p277_p0 = scmp.lt.s32.totalorder (!%p227_p11), %s2500_s13, 7 }
  0x1b   : > { %s3073_s12 = scalar_select %p105_p12, %s2900_s17, %s107_s11  }
  0x1c   : > { %p286_p1 = scmp.lt.s32.totalorder (!%p227_p11), %s2904_s18, 1 }
  0x1d   : > { %v2930_v0 = vmov 0   ;;  %s276_s14 = scalar_select %p275_p13, %s2912_s20, 1  ;;  %v2931_v1 = vmov 1   ;;  %v2932_v6 = vmov 2  }
  0x1e   : > { %2780 = vset.pattern.permute.xlu1 %v2930_v0  ;;  %2779 = vset.pattern.permute.xlu0 %v2930_v0  ;;  %s4318_s13 = smov (!%p277_p0, %s2500_s13), 7 }
  0x1f   : > { %2781 = vset.pattern.permute.xlu2 %v2931_v1  ;;  %s2501_s6 = sshll.u32 %s276_s14, 3  ;;  %s2503_s28 = sshll.u32 %s276_s14, 1 }
  0x20   : > { %s280_s7 = sadd.s32 %s2501_s6, %s4318_s13  ;;  %s2634_s13 = sshll.u32 %s2908_s19, 3 }
  0x21   : > { %s2502_s8 = sshll.u32 %s280_s7, 3  ;;  %s4018_s14 = sadd.s32 %s2904_s18, %s2634_s13 }
  0x22   : > { %s282_s11 = scalar_lea.vmem %s4256_s0, %s2502_s8  ;;  %s2624_s6 = sshll.u32 %s2912_s20, 4 }
  0x23   : > { %v297_v2 = vld [vmem:[%s282_s11 + $0x10] sm:$0xff]  ;;  %v295_v3 = vld [vmem:[%s282_s11] sm:$0xff]  ;;  %s287_s25 = scalar_select %p286_p1, %s2904_s18, 1  ;;  %v298_v4 = vld [vmem:[%s282_s11 + $0x18] sm:$0xff] }
  0x24   : > { %314 = vperm.xlu1 %2780, %v297_v2   ;;  %304 = vperm.xlu0 %2779, %v295_v3   ;;  %v296_v5 = vld [vmem:[%s282_s11 + $0x8] sm:$0xff]  ;;  %s2222_s7 = sadd.s32 %s2624_s6, %s4018_s14 }
  0x25   : > { %328 = vperm.xlu2 %2781, %v295_v3   ;;  %s289_s29 = sadd.s32 %s2503_s28, %s287_s25  ;;  %s2625_s8 = sshll.u32 %s2222_s7, 3 }
  0x26   : > { %s2504_s27 = sshll.u32 %s289_s29, 2  ;;  %s2224_s19 = scalar_lea.hbm %s4258_s2, %s2625_s8 }
  0x27   : > { %s291_s22 = scalar_lea.vmem %s4257_s1, %s2504_s27  ;;  %s2227_s11 = sshll.u32 %s2224_s19, 4  ;;  %s2228_s11 = int_to_ptr.hbm [resolvable:$true] %s2227_s11 }
  0x28   : > { %v2787_v9 = vld [vmem:[%s291_s22 + $0x1] ss:$0 sm:$0xff]  ;;  %v3088_v10 = vld [vmem:[%s291_s22 + $0x2] ss:$0 sm:$0xff]  ;;  %v2788_v13 = vld [vmem:[%s291_s22] ss:$0 sm:$0xff] }
  0x29   : > { %s3171_s22 = sand.u32 1, %s2896_s16   ;;  %s2834_s8 = scalar_lea.hbm %s4258_s2, 256 }
  0x2a   : > { %s2637_s23 = smul.u32 96, %s3171_s22  ;;  %s2499_s26 = sshll.u32 %s3171_s22, 5 }
  0x2b   : > { %s3283_s27 = scalar_lea.vmem [#allocation2], %s2499_s26  ;;  %s2638_s28 = smul.u32 640, %s3171_s22 }
  0x2c   : > { %319 = vperm.xlu1 %2780, %v298_v4   ;;  %309 = vperm.xlu0 %2779, %v296_v5   ;;  %s3192_s25 = scalar_lea.vmem [#allocation4], %s2637_s23  ;;  %s2225_s18 = sshll.u32 %s3283_s27, 4  ;;  %s2226_s18 = int_to_ptr.vmem [resolvable:$true] %s2225_s18 }
  0x2d   : > { %332 = vperm.xlu2 %2781, %v296_v5   ;;  %s3546_s29 = scalar_lea.vmem [#allocation6], %s2638_s28  ;;  %s4293_s23 = sadd.s32 4294967295, %s2928_s24  }
  0x2e   : > { %s4034_s26 = sand.u32 1, %s4293_s23   ;;  %s2199_s28 = scalar_lea.sflag [#allocation3], %s3171_s22 }
  0x34   : > { %2783 = vset.pattern.permute.xlu1 %v2931_v1  ;;  %2782 = vset.pattern.permute.xlu0 %v2931_v1 }
  0x35   : > { %340 = vperm.xlu1 %2783, %v298_v4   ;;  %336 = vperm.xlu0 %2782, %v297_v2  }
  0x36   : > { %2784 = vset.pattern.permute.xlu2 %v2932_v6 }
  0x37   : > { %349 = vperm.xlu2 %2784, %v295_v3  }
  0x3d   : > { %2785 = vset.pattern.permute.xlu1 %v2932_v6  ;;  %2786 = vset.pattern.permute.xlu0 %v2932_v6 }
  0x3e   : > { %353 = vperm.xlu1 %2785, %v296_v5   ;;  %361 = vperm.xlu0 %2786, %v298_v4  }
  0x3f   : > { %357 = vperm.xlu2 %2784, %v297_v2  }
  0x7f   : > { %v329_v7 = vpop.permute.xlu2 %328 }
  0x80   : > { %v3090_v12 = vsub.f32 %v329_v7, %v2787_v9 }
  0x82   : > { %v373_v17 = vmul.f32 %v3090_v12, %v3090_v12 }
  0x87   : > { %v333_v8 = vpop.permute.xlu2 %332 }
  0x88   : > { %v3143_v53 = vsub.f32 %v333_v8, %v2787_v9 }
  0x8a   : > { %v374_v60 = vmul.f32 %v3143_v53, %v3143_v53 }
  0x91   : > { %v350_v11 = vpop.permute.xlu2 %349 }
  0x92   : > { %v3093_v14 = vsub.f32 %v350_v11, %v3088_v10 }
  0x94   : > { %v381_v20 = vmul.f32 %v3093_v14, %v3093_v14 }
  0x96   : > { %v315_v15 = vpop.permute.xlu1 %314  ;;  %v305_v16 = vpop.permute.xlu0 %304 }
  0x97   : > { %v3097_v18 = vsub.f32 %v305_v16, %v2788_v13  ;;  %v3108_v28 = vsub.f32 %v315_v15, %v2788_v13 }
  0x99   : > { %v369_v19 = vmul.f32 %v3097_v18, %v3097_v18  ;;  %v358_v26 = vpop.permute.xlu2 %357  ;;  %v371_v36 = vmul.f32 %v3108_v28, %v3108_v28 }
  0x9a   : > { %v3111_v29 = vsub.f32 %v358_v26, %v3088_v10 }
  0x9b   : > { %v377_v21 = vadd.f32 %v373_v17, %v369_v19 }
  0x9c   : > { %v383_v37 = vmul.f32 %v3111_v29, %v3111_v29 }
  0x9d   : > { %v3103_v22 = vadd.f32 %v381_v20, %v377_v21 }
  0x9e   : > { %v320_v23 = vpop.permute.xlu1 %319  ;;  %v310_v24 = vpop.permute.xlu0 %309 }
  0x9f   : > { %2790 = vrsqrt.f32 %v3103_v22  ;;  %v3106_v25 = vsub.f32 %v320_v23, %v2788_v13  ;;  %vm396_vm0 = vcmp.eq.f32.partialorder %v3103_v22, inf  ;;  %v399_v48 = vand.u32 2147483648, %v3103_v22 }
  0xa0   : > { %vm398_vm1 = vcmp.eq.f32.partialorder %v3103_v22, 0.0  ;;  %v3140_v51 = vsub.f32 %v310_v24, %v2788_v13  ;;  %vm437_vm6 = vcmp.gt.f32.partialorder %v3103_v22, 0.0 }
  0xa1   : > { %v372_v39 = vmul.f32 %v3106_v25, %v3106_v25 }
  0xa2   : > { %v370_v58 = vmul.f32 %v3140_v51, %v3140_v51 }
  0xa4   : > { %v378_v3 = vadd.f32 %v374_v60, %v370_v58  ;;  %v2935_v60 = vmov 2131351028  }
  0xa5   : > { %v2791_v27 = vpop.eup %2790 }
  0xa6   : > { %v390_v30 = vmul.f32 %v2791_v27, %v3103_v22 }
  0xa7   : > { %v341_v31 = vpop.permute.xlu1 %340  ;;  %v337_v32 = vpop.permute.xlu0 %336 }
  0xa8   : > { %v391_v33 = vmul.f32 %v2791_v27, %v390_v30  ;;  %v3114_v34 = vsub.f32 %v341_v31, %v2787_v9  ;;  %v3116_v35 = vsub.f32 %v337_v32, %v2787_v9 }
  0xaa   : > { %v392_v38 = vmul.f32 0.5, %v391_v33  ;;  %v376_v40 = vmul.f32 %v3114_v34, %v3114_v34  ;;  %v375_v41 = vmul.f32 %v3116_v35, %v3116_v35 }
  0xac   : > { %v393_v42 = vsub.f32 1.5, %v392_v38  ;;  %v3128_v43 = vadd.f32 %v376_v40, %v372_v39  ;;  %v379_v44 = vadd.f32 %v375_v41, %v371_v36 }
  0xae   : > { %v394_v45 = vmul.f32 %v2791_v27, %v393_v42  ;;  %v3130_v46 = vadd.f32 %v383_v37, %v379_v44 }
  0xb0   : > { %v395_v47 = vmul.f32 %v394_v45, %v3103_v22  ;;  %2792 = vrsqrt.f32 %v3130_v46  ;;  %v354_v52 = vpop.permute.xlu1 %353  ;;  %vm420_vm7 = vcmp.eq.f32.partialorder %v3130_v46, inf  ;;  %v423_v33 = vand.u32 2147483648, %v3130_v46 }
  0xb1   : > { %v3147_v55 = vsub.f32 %v354_v52, %v3088_v10  ;;  %vm422_vm9 = vcmp.eq.f32.partialorder %v3130_v46, 0.0 }
  0xb2   : > { %v397_v49 = vsel %vm396_vm0, %v3103_v22, %v395_v47  ;;  %vm439_vm0 = vcmp.gt.f32.partialorder %v3130_v46, 0.0 }
  0xb3   : > { %v3138_v50 = vsel %vm398_vm1, %v399_v48, %v397_v49  ;;  %v382_v61 = vmul.f32 %v3147_v55, %v3147_v55  ;;  %v2933_v49 = vmov 683565275  }
  0xb4   : > { %2794 = vrcp.f32 %v3138_v50  ;;  %v535_v54 = vadd.f32 1e-11, %v3138_v50  ;;  %v452_v8 = vand.u32 2147483648, %v3138_v50  ;;  %v450_v15 = vand.u32 2147483647, %v3138_v50  ;;  %505 = vst [vmem:[%s3283_s27] sm:$0xff] %v3138_v50 }
  0xb5   : > { %v3164_v7 = vadd.f32 %v382_v61, %v378_v3  ;;  %vm446_vm3 = vweird.f32 %v3138_v50 }
  0xb6   : > { %v2793_v56 = vpop.eup %2792  ;;  %v3149_v57 = vadd.f32 0.5, %v535_v54  ;;  %v453_v21 = vor.u32 1.1754944e-38, %v452_v8  ;;  %vm451_vm5 = vcmp.eq.f32.partialorder %v450_v15, 8.507059e+37  ;;  %v2934_v54 = vmov 2475754826  }
  0xb7   : > { %v414_v59 = vmul.f32 %v2793_v56, %v3130_v46 }
  0xb8   : > { %v3159_v63 = vmul.f32 0.8975979, %v3149_v57  ;;  %2796 = vrcp.f32 %v3149_v57 }
  0xb9   : > { %v415_v1 = vmul.f32 %v2793_v56, %v414_v59  ;;  %2798 = vrsqrt.f32 %v3164_v7 }
  0xba   : > { %v2795_v62 = vpop.eup %2794  ;;  %v631_v4 = vand.u32 2147483647, %v3159_v63  ;;  %v634_v6 = vand.u32 2139095040, %v3159_v63 }
  0xbb   : > { %v442_v2 = vmul.f32 %v2795_v62, %v3138_v50  ;;  %v416_v11 = vmul.f32 0.5, %v415_v1  ;;  %vm447_vm2 = vweird.f32 %v2795_v62  ;;  %v2936_v1 = vmov 2102212464  }
  0xbc   : > { %v638_v9 = vand.u32 8388607, %v631_v4  ;;  %v635_v16 = vshrl.u32 %v634_v6, 23  ;;  %vm448_vm4 = vmor %vm446_vm3, %vm447_vm2 }
  0xbd   : > { %v443_v5 = vsub.f32 1.0, %v442_v2  ;;  %v417_v17 = vsub.f32 1.5, %v416_v11 }
  0xbe   : > { %v2521_v20 = vadd.s32 4294967169, %v635_v16  ;;  %v639_v23 = vor.u32 8388608, %v638_v9  ;;  %v3181_v36 = vpop.eup %2796  ;;  %v2938_v9 = vmov 1326507024  }
  0xbf   : > { %v444_v13 = vmul.f32 %v2795_v62, %v443_v5  ;;  %v418_v24 = vmul.f32 %v2793_v56, %v417_v17  ;;  %v3188_v22 = vpop.eup %2798  ;;  %v2937_v5 = vmov 920167782  }
  0xc0   : > { %v641_v27 = vadd.s32 1, %v2521_v20  ;;  %v3186_v40 = vshll.u32 %v639_v23, 8  ;;  %v402_v47 = vmul.f32 %v3188_v22, %v3164_v7 }
  0xc1   : > { %v445_v19 = vadd.f32 %v2795_v62, %v444_v13  ;;  %v419_v32 = vmul.f32 %v418_v24, %v3130_v46 }
  0xc2   : > { %vm642_vm8 = vcmp.gt.s32.totalorder %v641_v27, 0  ;;  %v3205_v45 = vand.u32 65535, %v3186_v40  ;;  %v681_v58 = vshrl.u32 %v3186_v40, 16  ;;  %v403_v17 = vmul.f32 %v3188_v22, %v402_v47 }
  0xc3   : > { %v449_v26 = vsel %vm448_vm4, %v2795_v62, %v445_v19  ;;  %v643_v41 = vsel %vm642_vm8, %v641_v27, 0  ;;  %v421_v42 = vsel %vm420_vm7, %v3130_v46, %v419_v32  ;;  %vm543_vm8 = vcmp.lt.f32.partialorder %v3149_v57, 3.5 }
  0xc4   : > { %v454_v30 = vsel %vm451_vm5, %v453_v21, %v449_v26  ;;  %v3195_v44 = vsel %vm422_vm9, %v423_v33, %v421_v42  ;;  %v3209_v48 = vshrl.u32 %v643_v41, 5  ;;  %vm547_vm9 = vcmp.gt.f32.partialorder %v3149_v57, 0.0 }
  0xc5   : > { %v501_v31 = vsel %vm437_vm6, %v454_v30, 0.0  ;;  %2800 = vrcp.f32 %v3195_v44  ;;  %v480_v23 = vand.u32 2147483647, %v3195_v44  ;;  %vm476_vm14 = vweird.f32 %v3195_v44  ;;  %507 = vst [vmem:[%s3283_s27 + $0x10] sm:$0xff] %v3195_v44 }
  0xc6   : > { %v509_v37 = vmul.f32 %v501_v31, %v3097_v18  ;;  %v517_v38 = vmul.f32 %v501_v31, %v3090_v12  ;;  %v526_v39 = vmul.f32 %v501_v31, %v3093_v14  ;;  %v645_v18 = vand.u32 31, %v643_v41 }
  0xc7   : > { %v3202_v12 = vmul.f32 %v3181_v36, %v3149_v57  ;;  %vm663_vm10 = vcmp.lt.s32.totalorder %v3209_v48, 1  ;;  %vm666_vm11 = vcmp.lt.s32.totalorder %v3209_v48, 4  ;;  %vm665_vm12 = vcmp.lt.s32.totalorder %v3209_v48, 3 }
  0xc8   : > { %513 = vst [vmem:[%s3192_s25] sm:$0xff] %v509_v37  ;;  %v646_v14 = vsub.s32 32, %v645_v18  ;;  %v648_v52 = vshll.u32 %v2933_v49, %v645_v18  ;;  %v651_v56 = vshll.u32 %v2934_v54, %v645_v18  ;;  %v654_v62 = vshll.u32 %v2935_v60, %v645_v18 }
  0xc9   : > { %2505 = vst [vmem:[%s3192_s25 + $0x20] sm:$0xff] %v517_v38  ;;  %v657_v3 = vshll.u32 %v2936_v1, %v645_v18  ;;  %v660_v8 = vshll.u32 %v2937_v5, %v645_v18  ;;  %vm664_vm13 = vcmp.lt.s32.totalorder %v3209_v48, 2  ;;  %v482_v18 = vand.u32 2147483648, %v3195_v44 }
  0xca   : > { %2509 = vst [vmem:[%s3192_s25 + $0x40] sm:$0xff] %v526_v39  ;;  %v649_v59 = vshrl.u32 %v2934_v54, %v646_v14  ;;  %v652_v61 = vshrl.u32 %v2935_v60, %v646_v14  ;;  %v655_v2 = vshrl.u32 %v2936_v1, %v646_v14  ;;  %v658_v6 = vshrl.u32 %v2937_v5, %v646_v14 }
  0xcb   : > { %v661_v11 = vshrl.u32 %v2938_v9, %v646_v14  ;;  %v3223_v19 = vpop.eup %2800  ;;  %v647_v24 = vshrl.u32 %v2933_v49, %v646_v14  ;;  %vm3251_vm15 = vcmp.eq.f32.partialorder %v480_v23, 8.507059e+37  ;;  %v404_v23 = vmul.f32 0.5, %v403_v17 }
  0xcc   : > { %v650_v13 = vor.u32 %v649_v59, %v648_v52  ;;  %v653_v15 = vor.u32 %v652_v61, %v651_v56  ;;  %v656_v16 = vor.u32 %v655_v2, %v654_v62  ;;  %v659_v20 = vor.u32 %v658_v6, %v657_v3 }
  0xcd   : > { %v662_v21 = vor.u32 %v661_v11, %v660_v8  ;;  %v472_v32 = vmul.f32 %v3223_v19, %v3195_v44  ;;  %vm477_vm1 = vweird.f32 %v3223_v19  ;;  %v569_v46 = vsub.f32 1.0, %v3202_v12 }
  0xce   : > { %v671_v26 = vsel %vm663_vm10, %v650_v13, %v653_v15  ;;  %v675_v27 = vsel %vm663_vm10, %v653_v15, %v656_v16  ;;  %v672_v30 = vsel %vm666_vm11, %v659_v20, 920167782  ;;  %v668_v33 = vsel %vm666_vm11, %v656_v16, 2102212464  ;;  %vm478_vm4 = vmor %vm476_vm14, %vm477_vm1 }
  0xcf   : > { %v676_v31 = vsel %vm666_vm11, %v662_v21, 1326507024  ;;  %v673_v37 = vsel %vm665_vm12, %v656_v16, %v672_v30  ;;  %v473_v42 = vsub.f32 1.0, %v472_v32  ;;  %v667_v59 = vsel %vm663_vm10, %v647_v24, %v650_v13 }
  0xd0   : > { %v677_v38 = vsel %vm665_vm12, %v659_v20, %v676_v31  ;;  %v674_v39 = vsel %vm664_vm13, %v671_v26, %v673_v37  ;;  %v669_v61 = vsel %vm665_vm12, %v653_v15, %v668_v33  ;;  %v483_v13 = vor.u32 1.1754944e-38, %v482_v18  ;;  %vm551_vm12 = vmand %vm543_vm8, %vm547_vm9 }
  0xd1   : > { %v678_v41 = vsel %vm664_vm13, %v675_v27, %v677_v38  ;;  %v704_v52 = vand.u32 65535, %v674_v39  ;;  %v705_v56 = vshrl.u32 %v674_v39, 16  ;;  %v474_v6 = vmul.f32 %v3223_v19, %v473_v42 }
  0xd2   : > { %v682_v14 = vand.u32 65535, %v678_v41  ;;  %v683_v47 = vshrl.u32 %v678_v41, 16  ;;  %v537_v15 = vadd.f32 1e-11, %v3195_v44  ;;  %v570_v48 = vmul.f32 %v3181_v36, %v569_v46 }
  0xd3   : > { %v707_v8 = vmul.u32 %v705_v56, %v3205_v45  ;;  %v708_v11 = vmul.u32 %v704_v52, %v681_v58  ;;  %v706_v26 = vmul.u32 %v704_v52, %v3205_v45  ;;  %v709_v27 = vmul.u32 %v705_v56, %v681_v58 }
  0xd4   : > { %v685_v2 = vmul.u32 %v683_v47, %v3205_v45  ;;  %v686_v3 = vmul.u32 %v682_v14, %v681_v58  ;;  %v684_v16 = vmul.u32 %v682_v14, %v3205_v45  ;;  %v687_v20 = vmul.u32 %v683_v47, %v681_v58 }
  0xd5   : > { %v710_v30 = vshll.u32 %v707_v8, 16  ;;  %v475_v33 = vadd.f32 %v3223_v19, %v474_v6  ;;  %v712_v38 = vshll.u32 %v708_v11, 16  ;;  %v3275_v56 = vadd.f32 0.5, %v537_v15 }
  0xd6   : > { %v688_v21 = vshll.u32 %v685_v2, 16  ;;  %v689_v24 = vshrl.u32 %v685_v2, 16  ;;  %v690_v31 = vshll.u32 %v686_v3, 16  ;;  %v691_v41 = vshrl.u32 %v686_v3, 16 }
  0xd7   : > { %vm714_vm3 = vc.u32 %v706_v26, %v710_v30  ;;  %v716_v39 = vadd.s32 %v710_v30, %v706_v26  ;;  %v479_v58 = vsel %vm478_vm4, %v3223_v19, %v475_v33  ;;  %v711_v2 = vshrl.u32 %v707_v8, 16 }
  0xd8   : > { %vm692_vm2 = vc.u32 %v684_v16, %v688_v21  ;;  %v694_v32 = vadd.s32 %v688_v21, %v684_v16  ;;  %v715_v45 = vsel %vm714_vm3, 1, %v2930_v0  ;;  %v484_v52 = vsel %vm3251_vm15, %v483_v13, %v479_v58 }
  0xd9   : > { %v693_v37 = vsel %vm692_vm2, 1, %v2930_v0  ;;  %v717_v18 = vadd.s32 %v715_v45, %v709_v27  ;;  %vm718_vm6 = vc.u32 %v716_v39, %v712_v38  ;;  %v503_v19 = vsel %vm439_vm0, %v484_v52, 0.0 }
  0xda   : > { %v695_v17 = vadd.s32 %v693_v37, %v687_v20  ;;  %vm696_vm5 = vc.u32 %v694_v32, %v690_v31  ;;  %v719_v47 = vsel %vm718_vm6, 1, %v2930_v0  ;;  %v405_v3 = vsub.f32 1.5, %v404_v23 }
  0xdb   : > { %v697_v42 = vsel %vm696_vm5, 1, %v2930_v0  ;;  %v721_v6 = vadd.s32 %v719_v47, %v717_v18  ;;  %v511_v20 = vmul.f32 %v503_v19, %v3108_v28  ;;  %v519_v21 = vmul.f32 %v503_v19, %v3116_v35 }
  0xdc   : > { %v699_v14 = vadd.s32 %v697_v42, %v695_v17  ;;  %v528_v26 = vmul.f32 %v503_v19, %v3111_v29  ;;  %v713_v62 = vshrl.u32 %v708_v11, 16  ;;  %v720_v15 = vadd.s32 %v716_v39, %v712_v38 }
  0xdd   : > { %v722_v8 = vadd.s32 %v721_v6, %v711_v2  ;;  %515 = vst [vmem:[%s3192_s25 + $0x10] sm:$0xff] %v511_v20  ;;  %v3292_v28 = vmul.f32 0.8975979, %v3275_v56  ;;  %v670_v29 = vsel %vm664_vm13, %v667_v59, %v669_v61  ;;  %v406_v23 = vmul.f32 %v3188_v22, %v405_v3 }
  0xde   : > { %v700_v16 = vadd.s32 %v699_v14, %v689_v24  ;;  %2507 = vst [vmem:[%s3192_s25 + $0x30] sm:$0xff] %v519_v21  ;;  %2802 = vrcp.f32 %v3275_v56  ;;  %v724_v59 = vmul.u32 %v3186_v40, %v670_v29  ;;  %vm408_vm10 = vcmp.eq.f32.partialorder %v3164_v7, inf }
  0xdf   : > { %v723_v35 = vadd.s32 %v722_v8, %v713_v62  ;;  %2511 = vst [vmem:[%s3192_s25 + $0x50] sm:$0xff] %v528_v26  ;;  %v941_v50 = vand.u32 2147483647, %v3292_v28  ;;  %v944_v12 = vand.u32 2139095040, %v3292_v28  ;;  %v407_v24 = vmul.f32 %v406_v23, %v3164_v7 }
  0xe0   : > { %v701_v13 = vadd.s32 %v700_v16, %v691_v41  ;;  %v411_v30 = vand.u32 2147483648, %v3164_v7  ;;  %vm410_vm11 = vcmp.eq.f32.partialorder %v3164_v7, 0.0  ;;  %v571_v40 = vadd.f32 %v3181_v36, %v570_v48 }
  0xe1   : > { %v727_v44 = vadd.s32 1, %v723_v35  ;;  %v945_v11 = vshrl.u32 %v944_v12, 23  ;;  %v948_v22 = vand.u32 8388607, %v941_v50  ;;  %v409_v32 = vsel %vm408_vm10, %v3164_v7, %v407_v24 }
  0xe2   : > { %vm726_vm7 = vc.u32 %v701_v13, %v720_v15  ;;  %vm573_vm13 = vweird.f32 %v3181_v36  ;;  %v3315_v37 = vsel %vm410_vm11, %v411_v30, %v409_v32  ;;  %v578_v39 = vand.u32 2147483648, %v3149_v57 }
  0xe3   : > { %v728_v61 = vsel %vm726_vm7, %v727_v44, %v723_v35  ;;  %v2527_v31 = vadd.s32 4294967169, %v945_v11  ;;  %v949_v17 = vor.u32 8388608, %v948_v22  ;;  %506 = vst [vmem:[%s3283_s27 + $0x8] sm:$0xff] %v3315_v37  ;;  %vm572_vm14 = vweird.f32 %v3149_v57 }
  0xe4   : > { %v729_v27 = vadd.s32 %v728_v61, %v724_v59  ;;  %v3317_v38 = vpop.eup %2802  ;;  %v576_v58 = vand.u32 2147483647, %v3149_v57  ;;  %v2939_v42 = vmov 0.0   ;;  %vm574_vm15 = vmor %vm572_vm14, %vm573_vm13  ;;  %v579_v6 = vor.u32 1.1754944e-38, %v578_v39 }
  0xe5   : > { %v951_v45 = vadd.s32 1, %v2527_v31  ;;  %v2517_v18 = vsel %vm551_vm12, 1.0, %v2939_v42  ;;  %v575_v14 = vsel %vm574_vm15, %v3181_v36, %v571_v40  ;;  %v3328_v52 = vmul.f32 %v3317_v38, %v3275_v56 }
  0xe6   : > { %v730_v33 = vadd.s32 536870912, %v729_v27  ;;  %v3330_v3 = vshll.u32 %v949_v17, 8  ;;  %v3332_v16 = vmul.f32 0.75592893, %v2517_v18  ;;  %vm577_vm1 = vcmp.eq.f32.partialorder %v576_v58, 8.507059e+37 }
  0xe7   : > { %vm952_vm0 = vcmp.gt.s32.totalorder %v951_v45, 0  ;;  %vm633_vm2 = vcmp.lt.s32.totalorder %v3159_v63, 0  ;;  %v3335_v20 = vsel %vm577_vm1, %v579_v6, %v575_v14  ;;  %v725_v21 = vadd.s32 %v720_v15, %v701_v13 }
  0xe8   : > { %v731_v41 = vshrl.u32 %v730_v33, 30  ;;  %v953_v2 = vsel %vm952_vm0, %v951_v45, 0  ;;  %v467_v26 = vand.u32 2147483648, %v3315_v37  ;;  %v597_v46 = vsub.f32 1.0, %v3328_v52 }
  0xe9   : > { %v955_v19 = vand.u32 31, %v953_v2  ;;  %v3341_v35 = vand.u32 65535, %v3330_v3  ;;  %2804 = vrcp.f32 %v3315_v37  ;;  %v465_v23 = vand.u32 2147483647, %v3315_v37 }
  0xea   : > { %v732_v47 = vshll.u32 %v731_v41, 30  ;;  %v755_v8 = vsub.s32 4, %v731_v41  ;;  %v3347_v15 = vshrl.u32 %v3330_v3, 16  ;;  %v536_v12 = vadd.f32 1e-11, %v3315_v37 }
  0xeb   : > { %v956_v36 = vsub.s32 32, %v955_v19  ;;  %v3350_v59 = vshrl.u32 %v953_v2, 5  ;;  %v958_v61 = vshll.u32 %v2933_v49, %v955_v19  ;;  %v3353_v11 = vor.u32 1.1754944e-38, %v467_v26 }
  0xec   : > { %v733_v57 = vsub.s32 %v729_v27, %v732_v47  ;;  %v756_v22 = vsel %vm633_vm2, %v755_v8, %v731_v41  ;;  %v961_v24 = vshll.u32 %v2934_v54, %v955_v19  ;;  %v964_v27 = vshll.u32 %v2935_v60, %v955_v19 }
  0xed   : > { %v959_v29 = vshrl.u32 %v2934_v54, %v956_v36  ;;  %v962_v13 = vshrl.u32 %v2935_v60, %v956_v36  ;;  %v965_v30 = vshrl.u32 %v2936_v1, %v956_v36  ;;  %vm3362_vm4 = vcmp.le.f32.partialorder %v631_v4, 0.7853982 }
  0xee   : > { %vm734_vm3 = vcmp.lt.s32.totalorder %v733_v57, 0  ;;  %v735_v62 = vsub.s32 0, %v733_v57  ;;  %v967_v33 = vshll.u32 %v2936_v1, %v955_v19  ;;  %v968_v39 = vshrl.u32 %v2937_v5, %v956_v36 }
  0xef   : > { %v960_v40 = vor.u32 %v959_v29, %v958_v61  ;;  %v963_v17 = vor.u32 %v962_v13, %v961_v24  ;;  %v966_v45 = vor.u32 %v965_v30, %v964_v27  ;;  %v970_v58 = vshll.u32 %v2937_v5, %v955_v19  ;;  %v3370_v18 = vpop.eup %2804 }
  0xf0   : > { %v736_v44 = vsel %vm734_vm3, %v735_v62, %v733_v57  ;;  %v971_v41 = vshrl.u32 %v2938_v9, %v956_v36  ;;  %v957_v4 = vshrl.u32 %v2933_v49, %v956_v36  ;;  %v969_v14 = vor.u32 %v968_v39, %v967_v33 }
  0xf1   : > { %v737_v48 = vclz %v736_v44  ;;  %v3373_v47 = vadd.f32 0.5, %v536_v12  ;;  %vm973_vm6 = vcmp.lt.s32.totalorder %v3350_v59, 1  ;;  %vm974_vm7 = vcmp.lt.s32.totalorder %v3350_v59, 2 }
  0xf2   : > { %v972_v6 = vor.u32 %v971_v41, %v970_v58  ;;  %vm975_vm8 = vcmp.lt.s32.totalorder %v3350_v59, 3  ;;  %vm976_vm9 = vcmp.lt.s32.totalorder %v3350_v59, 4  ;;  %v981_v8 = vsel %vm973_vm6, %v960_v40, %v963_v17 }
  0xf3   : > { %v2522_v32 = vadd.s32 4294967294, %v737_v48  ;;  %v982_v36 = vsel %vm976_vm9, %v969_v14, 920167782  ;;  %v985_v29 = vsel %vm973_vm6, %v963_v17, %v966_v45  ;;  %v978_v61 = vsel %vm976_vm9, %v966_v45, 2102212464 }
  0xf4   : > { %v983_v12 = vsel %vm975_vm8, %v966_v45, %v982_v36  ;;  %v986_v48 = vsel %vm976_vm9, %v972_v6, 1326507024  ;;  %v457_v27 = vmul.f32 %v3370_v18, %v3315_v37  ;;  %v3395_v39 = vsel %vm3362_vm4, 0, %v756_v22 }
  0xf5   : > { %vm2523_vm5 = vcmp.lt.s32.totalorder %v2522_v32, 0  ;;  %v984_v24 = vsel %vm974_vm7, %v981_v8, %v983_v12  ;;  %v3403_v6 = vsel %vm975_vm8, %v963_v17, %v978_v61  ;;  %vm461_vm10 = vweird.f32 %v3315_v37 }
  0xf6   : > { %v740_v2 = vsel %vm2523_vm5, 0, %v2522_v32  ;;  %v1014_v33 = vand.u32 65535, %v984_v24  ;;  %v1015_v41 = vshrl.u32 %v984_v24, 16  ;;  %vm545_vm11 = vcmp.lt.f32.partialorder %v3275_v56, 3.5 }
  0xf7   : > { %v741_v26 = vsub.s32 32, %v740_v2  ;;  %v745_v62 = vsub.s32 4294967266, %v740_v2  ;;  %v742_v19 = vshll.u32 %v733_v57, %v740_v2  ;;  %v987_v57 = vsel %vm975_vm8, %v969_v14, %v986_v48 }
  0xf8   : > { %v3399_v14 = vsel %vm973_vm6, %v957_v4, %v960_v40  ;;  %vm549_vm12 = vcmp.gt.f32.partialorder %v3275_v56, 0.0  ;;  %v458_v40 = vsub.f32 1.0, %v457_v27  ;;  %v1016_v17 = vmul.u32 %v1014_v33, %v3341_v35 }
  0xf9   : > { %v743_v44 = vshrl.u32 %v725_v21, %v741_v26  ;;  %v746_v13 = vadd.s32 127, %v745_v62  ;;  %v988_v21 = vsel %vm974_vm7, %v985_v29, %v987_v57  ;;  %v3406_v26 = vmul.u32 %v1014_v33, %v3347_v15 }
  0xfa   : > { %v992_v45 = vand.u32 65535, %v988_v21  ;;  %v993_v58 = vshrl.u32 %v988_v21, 16  ;;  %v1017_v36 = vmul.u32 %v1015_v41, %v3341_v35  ;;  %vm3418_vm13 = vcmp.eq.f32.partialorder %v465_v23, 8.507059e+37 }
  0xfb   : > { %v744_v30 = vor.u32 %v743_v44, %v742_v19  ;;  %v747_v32 = vshll.u32 %v746_v13, 23  ;;  %v1019_v12 = vmul.u32 %v1015_v41, %v3347_v15  ;;  %v1022_v48 = vshll.u32 %v3406_v26, 16 }
  0xfc   : > { %v995_v22 = vmul.u32 %v993_v58, %v3341_v35  ;;  %v996_v19 = vmul.u32 %v992_v45, %v3347_v15  ;;  %v994_v8 = vmul.u32 %v992_v45, %v3341_v35  ;;  %v997_v44 = vmul.u32 %v993_v58, %v3347_v15 }
  0xfd   : > { %v748_v2 = vor.u32 4788187, %v747_v32  ;;  %v751_v62 = vcvt.s32.f32 %v744_v30  ;;  %vm438_vm14 = vcmp.gt.f32.partialorder %v3164_v7, 0.0  ;;  %v1020_v27 = vshll.u32 %v1017_v36, 16 }
  0xfe   : > { %v998_v13 = vshll.u32 %v995_v22, 16  ;;  %v999_v24 = vshrl.u32 %v995_v22, 16  ;;  %v1000_v57 = vshll.u32 %v996_v19, 16  ;;  %v459_v23 = vmul.f32 %v3370_v18, %v458_v40 }
  0xff   : > { %v749_v4 = vand.u32 2147483647, %v748_v2  ;;  %vm462_vm0 = vweird.f32 %v3370_v18  ;;  %vm1024_vm1 = vc.u32 %v1016_v17, %v1020_v27  ;;  %v1026_v21 = vadd.s32 %v1020_v27, %v1016_v17 }
 0x100   : > { %vm1002_vm15 = vc.u32 %v994_v8, %v998_v13  ;;  %v1004_v35 = vadd.s32 %v998_v13, %v994_v8  ;;  %v1025_v33 = vsel %vm1024_vm1, 1, %v2930_v0  ;;  %v460_v45 = vadd.f32 %v3370_v18, %v459_v23  ;;  %vm463_vm6 = vmor %vm461_vm10, %vm462_vm0 }
 0x101   : > { %v752_v61 = vmul.f32 %v751_v62, %v749_v4  ;;  %v1003_v32 = vsel %vm1002_vm15, 1, %v2930_v0  ;;  %v1027_v2 = vadd.s32 %v1025_v33, %v1019_v12  ;;  %vm1028_vm5 = vc.u32 %v1026_v21, %v1022_v48 }
 0x102   : > { %v1005_v15 = vadd.s32 %v1003_v32, %v997_v44  ;;  %vm1006_vm3 = vc.u32 %v1004_v35, %v1000_v57  ;;  %v1001_v22 = vshrl.u32 %v996_v19, 16  ;;  %v1029_v4 = vsel %vm1028_vm5, 1, %v2930_v0 }
 0x103   : > { %v753_v30 = vxor.u32 2147483648, %v752_v61  ;;  %v1007_v41 = vsel %vm1006_vm3, 1, %v2930_v0  ;;  %v1021_v17 = vshrl.u32 %v1017_v36, 16  ;;  %v1031_v44 = vadd.s32 %v1029_v4, %v1027_v2 }
 0x104   : > { %v1009_v40 = vadd.s32 %v1007_v41, %v1005_v15  ;;  %v464_v13 = vsel %vm463_vm6, %v3370_v18, %v460_v45  ;;  %v1023_v31 = vshrl.u32 %v3406_v26, 16  ;;  %v980_v35 = vsel %vm974_vm7, %v3399_v14, %v3403_v6 }
 0x105   : > { %v754_v58 = vsel %vm633_vm2, %v753_v30, %v752_v61  ;;  %v3448_v61 = vadd.s32 %v1026_v21, %v1022_v48  ;;  %v469_v19 = vsel %vm3418_vm13, %v3353_v11, %v464_v13  ;;  %vm553_vm2 = vmand %vm545_vm11, %vm549_vm12  ;;  %v1032_v37 = vadd.s32 %v1031_v44, %v1021_v17 }
 0x106   : > { %v3437_v62 = vsel %vm3362_vm4, %v3159_v63, %v754_v58  ;;  %v1010_v12 = vadd.s32 %v1009_v40, %v999_v24  ;;  %v502_v18 = vsel %vm438_vm14, %v469_v19, 0.0  ;;  %v3470_v7 = vmul.f32 %v3335_v20, %v3332_v16  ;;  %v362_v58 = vpop.permute.xlu0 %361 }
 0x107   : > { %v759_v8 = vmul.f32 %v3437_v62, %v3437_v62  ;;  %v510_v26 = vmul.f32 %v502_v18, %v3140_v51  ;;  %v518_v29 = vmul.f32 %v502_v18, %v3143_v53  ;;  %v527_v11 = vmul.f32 %v502_v18, %v3147_v55 }
 0x108   : > { %v3459_v36 = vadd.s32 %v1010_v12, %v1001_v22  ;;  %v1033_v23 = vadd.s32 %v1032_v37, %v1023_v31  ;;  %v3473_v51 = vsel %vm553_vm2, 1.0, %v2939_v42  ;;  %v598_v53 = vmul.f32 %v3317_v38, %v597_v46 }
 0x109   : > { %v760_v57 = vmul.f32 -0.001358992, %v759_v8  ;;  %v767_v27 = vmul.f32 -0.00019511016, %v759_v8  ;;  %514 = vst [vmem:[%s3192_s25 + $0x8] sm:$0xff] %v510_v26  ;;  %v606_v14 = vand.u32 2147483648, %v3275_v56  ;;  %v1034_v30 = vmul.u32 %v3330_v3, %v980_v35 }
 0x10a   : > { %vm1036_vm4 = vc.u32 %v3459_v36, %v3448_v61  ;;  %v1037_v6 = vadd.s32 1, %v1033_v23  ;;  %2506 = vst [vmem:[%s3192_s25 + $0x28] sm:$0xff] %v518_v29  ;;  %v775_v16 = vadd.s32 3, %v3395_v39  ;;  %v604_v20 = vand.u32 2147483647, %v3275_v56 }
 0x10b   : > { %v761_v48 = vadd.f32 0.041655596, %v760_v57  ;;  %v768_v24 = vadd.f32 0.008332121, %v767_v27  ;;  %2510 = vst [vmem:[%s3192_s25 + $0x48] sm:$0xff] %v527_v11  ;;  %vm600_vm7 = vweird.f32 %v3275_v56  ;;  %v1395_v15 = vand.u32 3, %v3395_v39 }
 0x10c   : > { %v3488_v52 = vmul.f32 0.8975979, %v3373_v47  ;;  %v1038_v21 = vsel %vm1036_vm4, %v1037_v6, %v1033_v23  ;;  %v599_v33 = vadd.f32 %v3317_v38, %v598_v53  ;;  %vm601_vm8 = vweird.f32 %v3317_v38 }
 0x10d   : > { %v762_v55 = vmul.f32 %v761_v48, %v759_v8  ;;  %v769_v59 = vmul.f32 %v768_v24, %v759_v8  ;;  %v1039_v45 = vadd.s32 %v1038_v21, %v1034_v30  ;;  %v607_v3 = vor.u32 1.1754944e-38, %v606_v14  ;;  %vm3511_vm13 = vmor %vm600_vm7, %vm601_vm8 }
 0x10e   : > { %vm943_vm9 = vcmp.lt.s32.totalorder %v3292_v28, 0  ;;  %vm774_vm10 = vweird.f32 %v3159_v63  ;;  %v776_v22 = vand.u32 3, %v775_v16  ;;  %vm3496_vm11 = vcmp.eq.f32.partialorder %v604_v20, 8.507059e+37 }
 0x10f   : > { %v763_v46 = vadd.f32 -0.4999988, %v762_v55  ;;  %v770_v32 = vadd.f32 -0.16666654, %v769_v59  ;;  %vm3502_vm12 = vcmp.le.f32.partialorder %v941_v50, 0.7853982  ;;  %v3517_v50 = vsub.f32 %v362_v58, %v3088_v10 }
 0x110   : > { %v1040_v4 = vadd.s32 536870912, %v1039_v45  ;;  %v789_v17 = vand.u32 2139095040, %v3488_v52  ;;  %v786_v12 = vand.u32 2147483647, %v3488_v52  ;;  %vm1396_vm14 = vcmp.lt.s32.totalorder %v1395_v15, 2 }
 0x111   : > { %v764_v41 = vmul.f32 %v763_v46, %v759_v8  ;;  %v771_v2 = vmul.f32 %v770_v32, %v759_v8  ;;  %v603_v31 = vsel %vm3511_vm13, %v3317_v38, %v599_v33  ;;  %vm1397_vm15 = vcmp.eq.s32.totalorder %v1395_v15, 0 }
 0x112   : > { %v1041_v19 = vshrl.u32 %v1040_v4, 30  ;;  %v790_v57 = vshrl.u32 %v789_v17, 23  ;;  %vm1400_vm0 = vcmp.eq.s32.totalorder %v1395_v15, 2  ;;  %vm777_vm1 = vcmp.lt.s32.totalorder %v776_v22, 2 }
 0x113   : > { %v765_v8 = vadd.f32 1.0, %v764_v41  ;;  %v772_v44 = vadd.f32 1.0, %v771_v2  ;;  %vm778_vm3 = vcmp.eq.s32.totalorder %v776_v22, 0  ;;  %vm781_vm5 = vcmp.eq.s32.totalorder %v776_v22, 2 }
 0x114   : > { %v1042_v37 = vshll.u32 %v1041_v19, 30  ;;  %v1065_v18 = vsub.s32 4, %v1041_v19  ;;  %v2524_v26 = vadd.s32 4294967169, %v790_v57  ;;  %v793_v29 = vand.u32 8388607, %v786_v12 }
 0x115   : > { %v773_v27 = vmul.f32 %v772_v44, %v3437_v62  ;;  %v782_v56 = vxor.u32 2147483648, %v765_v8  ;;  %v608_v20 = vsel %vm3496_vm11, %v607_v3, %v603_v31  ;;  %v565_v15 = vmul.f32 0.75592893, %v3473_v51 }
 0x116   : > { %v1043_v38 = vsub.s32 %v1039_v45, %v1042_v37  ;;  %v1066_v48 = vsel %vm943_vm9, %v1065_v18, %v1041_v19  ;;  %v796_v62 = vadd.s32 1, %v2524_v26  ;;  %v794_v30 = vor.u32 8388608, %v793_v29 }
 0x117   : > { %v779_v10 = vxor.u32 2147483648, %v773_v27  ;;  %v783_v11 = vsel %vm781_vm5, %v782_v56, %v773_v27  ;;  %v1402_v23 = vsel %vm1400_vm0, %v782_v56, %v773_v27  ;;  %v1068_v53 = vsel %vm3502_vm12, 0, %v1066_v48 }
 0x118   : > { %vm1044_vm6 = vcmp.lt.s32.totalorder %v1043_v38, 0  ;;  %v1045_v14 = vsub.s32 0, %v1043_v38  ;;  %vm797_vm2 = vcmp.gt.s32.totalorder %v796_v62, 0  ;;  %v1085_v45 = vadd.s32 3, %v1068_v53 }
 0x119   : > { %v780_v24 = vsel %vm778_vm3, %v765_v8, %v779_v10  ;;  %v1399_v35 = vsel %vm1397_vm15, %v765_v8, %v779_v10  ;;  %v384_v58 = vmul.f32 %v3517_v50, %v3517_v50  ;;  %v798_v41 = vsel %vm797_vm2, %v796_v62, 0 }
 0x11a   : > { %v784_v55 = vsel %vm777_vm1, %v780_v24, %v783_v11  ;;  %v1403_v59 = vsel %vm1396_vm14, %v1399_v35, %v1402_v23  ;;  %v1046_v21 = vsel %vm1044_vm6, %v1045_v14, %v1043_v38  ;;  %v3550_v2 = vmul.f32 %v608_v20, %v565_v15 }
 0x11b   : > { %v785_v6 = vsel %vm774_vm10, nan, %v784_v55  ;;  %v1404_v16 = vsel %vm774_vm10, nan, %v1403_v59  ;;  %v1047_v33 = vclz %v1046_v21  ;;  %v3552_v22 = vshll.u32 %v794_v30, 8 }
 0x11c   : > { %v3540_v46 = vmul.f32 2.0, %v1404_v16  ;;  %v1871_v32 = vmul.f32 %v785_v6, %v3470_v7  ;;  %v1035_v4 = vadd.s32 %v3448_v61, %v3459_v36  ;;  %v800_v17 = vand.u32 31, %v798_v41 }
 0x11d   : > { %v2528_v3 = vadd.s32 4294967294, %v1047_v33  ;;  %v3558_v8 = vand.u32 3, %v1085_v45  ;;  %v3560_v44 = vand.u32 3, %v1068_v53  ;;  %v3563_v13 = vadd.f32 %v384_v58, %v3128_v43 }
 0x11e   : > { %1875 = vst [vmem:[%s3546_s29] sm:$0xff] %v1871_v32  ;;  %v1879_v63 = vmul.f32 %v3540_v46, %v785_v6  ;;  %v3566_v57 = vshrl.u32 %v798_v41, 5  ;;  %v801_v27 = vsub.s32 32, %v800_v17  ;;  %v803_v61 = vshll.u32 %v2933_v49, %v800_v17 }
 0x11f   : > { %vm2529_vm4 = vcmp.lt.s32.totalorder %v2528_v3, 0  ;;  %v3570_v36 = vand.u32 65535, %v3552_v22  ;;  %v806_v48 = vshll.u32 %v2934_v54, %v800_v17  ;;  %v809_v23 = vshll.u32 %v2935_v60, %v800_v17 }
 0x120   : > { %v1883_v51 = vmul.f32 %v1879_v63, %v3470_v7  ;;  %v1892_v40 = vmul.f32 %v1879_v63, %v3540_v46  ;;  %v1050_v19 = vsel %vm2529_vm4, 0, %v2528_v3  ;;  %v804_v10 = vshrl.u32 %v2934_v54, %v801_v27 }
 0x121   : > { %v1051_v56 = vsub.s32 32, %v1050_v19  ;;  %v1055_v37 = vsub.s32 4294967266, %v1050_v19  ;;  %v1052_v43 = vshll.u32 %v1043_v38, %v1050_v19  ;;  %v807_v62 = vshrl.u32 %v2935_v60, %v801_v27 }
 0x122   : > { %2545 = vst [vmem:[%s3546_s29 + $0x20] sm:$0xff] %v1883_v51  ;;  %v1896_v31 = vsub.f32 %v1892_v40, %v785_v6  ;;  %v805_v35 = vor.u32 %v804_v10, %v803_v61  ;;  %v810_v53 = vshrl.u32 %v2936_v1, %v801_v27  ;;  %v812_v38 = vshll.u32 %v2936_v1, %v800_v17 }
 0x123   : > { %v1053_v29 = vshrl.u32 %v1035_v4, %v1051_v56  ;;  %v1056_v11 = vadd.s32 127, %v1055_v37  ;;  %v813_v14 = vshrl.u32 %v2937_v5, %v801_v27  ;;  %v808_v20 = vor.u32 %v807_v62, %v806_v48 }
 0x124   : > { %v1900_v18 = vmul.f32 %v1896_v31, %v3470_v7  ;;  %v1909_v26 = vmul.f32 %v1896_v31, %v3540_v46  ;;  %v811_v30 = vor.u32 %v810_v53, %v809_v23  ;;  %v815_v15 = vshll.u32 %v2937_v5, %v800_v17 }
 0x125   : > { %v1054_v55 = vor.u32 %v1053_v29, %v1052_v43  ;;  %v1057_v59 = vshll.u32 %v1056_v11, 23  ;;  %v814_v21 = vor.u32 %v813_v14, %v812_v38  ;;  %v816_v33 = vshrl.u32 %v2938_v9, %v801_v27 }
 0x126   : > { %2549 = vst [vmem:[%s3546_s29 + $0x40] sm:$0xff] %v1900_v18  ;;  %v1913_v24 = vsub.f32 %v1909_v26, %v1879_v63  ;;  %v802_v58 = vshrl.u32 %v2933_v49, %v801_v27  ;;  %v3589_v63 = vshrl.u32 %v3552_v22, 16  ;;  %2806 = vrsqrt.f32 %v3563_v13 }
 0x127   : > { %v1058_v32 = vor.u32 4788187, %v1057_v59  ;;  %v1061_v3 = vcvt.s32.f32 %v1054_v55  ;;  %v817_v51 = vor.u32 %v816_v33, %v815_v15  ;;  %vm818_vm7 = vcmp.lt.s32.totalorder %v3566_v57, 1 }
 0x128   : > { %v1917_v6 = vmul.f32 %v1913_v24, %v3470_v7  ;;  %v1926_v16 = vmul.f32 %v1913_v24, %v3540_v46  ;;  %vm821_vm8 = vcmp.lt.s32.totalorder %v3566_v57, 4  ;;  %v826_v17 = vsel %vm818_vm7, %v805_v35, %v808_v20 }
 0x129   : > { %v1059_v41 = vand.u32 2147483647, %v1058_v32  ;;  %vm820_vm10 = vcmp.lt.s32.totalorder %v3566_v57, 3  ;;  %v827_v19 = vsel %vm821_vm8, %v814_v21, 920167782  ;;  %v830_v27 = vsel %vm818_vm7, %v808_v20, %v811_v30 }
 0x12a   : > { %2553 = vst [vmem:[%s3546_s29 + $0x60] sm:$0xff] %v1917_v6  ;;  %v1930_v45 = vsub.f32 %v1926_v16, %v1896_v31  ;;  %vm819_vm11 = vcmp.lt.s32.totalorder %v3566_v57, 2  ;;  %v828_v37 = vsel %vm820_vm10, %v811_v30, %v827_v19  ;;  %v831_v61 = vsel %vm821_vm8, %v817_v51, 1326507024 }
 0x12b   : > { %v1062_v31 = vmul.f32 %v1061_v3, %v1059_v41  ;;  %v823_v26 = vsel %vm821_vm8, %v811_v30, 2102212464  ;;  %v829_v43 = vsel %vm819_vm11, %v826_v17, %v828_v37  ;;  %v832_v10 = vsel %vm820_vm10, %v814_v21, %v831_v61 }
 0x12c   : > { %v1934_v40 = vmul.f32 %v1930_v45, %v3470_v7  ;;  %v1943_v4 = vmul.f32 %v1930_v45, %v3540_v46  ;;  %v3609_v29 = vpop.eup %2806  ;;  %v833_v62 = vsel %vm819_vm11, %v830_v27, %v832_v10  ;;  %v860_v59 = vshrl.u32 %v829_v43, 16 }
 0x12d   : > { %v1063_v18 = vxor.u32 2147483648, %v1062_v31  ;;  %v837_v53 = vand.u32 65535, %v833_v62  ;;  %v838_v55 = vshrl.u32 %v833_v62, 16  ;;  %v3625_v6 = vsel %vm818_vm7, %v802_v58, %v805_v35 }
 0x12e   : > { %2557 = vst [vmem:[%s3546_s29 + $0x80] sm:$0xff] %v1934_v40  ;;  %v1947_v56 = vsub.f32 %v1943_v4, %v1913_v24  ;;  %v859_v24 = vand.u32 65535, %v829_v43  ;;  %v3629_v16 = vsel %vm820_vm10, %v808_v20, %v823_v26  ;;  %v3639_v35 = vmul.u32 %v860_v59, %v3570_v36 }
 0x12f   : > { %v1064_v23 = vsel %vm943_vm9, %v1063_v18, %v1062_v31  ;;  %v840_v32 = vmul.u32 %v838_v55, %v3570_v36  ;;  %v841_v21 = vmul.u32 %v837_v53, %v3589_v63  ;;  %v839_v41 = vmul.u32 %v837_v53, %v3570_v36 }
 0x130   : > { %v1951_v11 = vmul.f32 %v1947_v56, %v3470_v7  ;;  %v1960_v48 = vmul.f32 %v1947_v56, %v3540_v46  ;;  %v3621_v14 = vsel %vm3502_vm12, %v3292_v28, %v1064_v23  ;;  %v861_v39 = vmul.u32 %v859_v24, %v3570_v36 }
 0x131   : > { %v1069_v30 = vmul.f32 %v3621_v14, %v3621_v14  ;;  %v843_v3 = vshll.u32 %v840_v32, 16  ;;  %v842_v40 = vmul.u32 %v838_v55, %v3589_v63  ;;  %v844_v4 = vshrl.u32 %v840_v32, 16 }
 0x132   : > { %2561 = vst [vmem:[%s3546_s29 + $0xa0] sm:$0xff] %v1951_v11  ;;  %v1964_v38 = vsub.f32 %v1960_v48, %v1930_v45  ;;  %v3642_v45 = vmul.u32 %v859_v24, %v3589_v63  ;;  %v845_v17 = vshll.u32 %v841_v21, 16  ;;  %v865_v36 = vshll.u32 %v3639_v35, 16 }
 0x133   : > { %v1070_v20 = vmul.f32 -0.001358992, %v1069_v30  ;;  %v1077_v58 = vmul.f32 -0.00019511016, %v1069_v30  ;;  %vm847_vm9 = vc.u32 %v839_v41, %v843_v3  ;;  %v849_v27 = vadd.s32 %v843_v3, %v839_v41 }
 0x134   : > { %v1968_v15 = vmul.f32 %v1964_v38, %v3470_v7  ;;  %v1977_v33 = vmul.f32 %v1964_v38, %v3540_v46  ;;  %v848_v18 = vsel %vm847_vm9, 1, %v2930_v0  ;;  %v846_v11 = vshrl.u32 %v841_v21, 16 }
 0x135   : > { %v1071_v31 = vadd.f32 0.041655596, %v1070_v20  ;;  %v1078_v19 = vadd.f32 0.008332121, %v1077_v58  ;;  %vm851_vm12 = vc.u32 %v849_v27, %v845_v17  ;;  %v864_v62 = vmul.u32 %v860_v59, %v3589_v63 }
 0x136   : > { %2565 = vst [vmem:[%s3546_s29 + $0xc0] sm:$0xff] %v1968_v15  ;;  %v1981_v51 = vsub.f32 %v1977_v33, %v1947_v56  ;;  %v850_v56 = vadd.s32 %v848_v18, %v842_v40  ;;  %v852_v48 = vsel %vm851_vm12, 1, %v2930_v0  ;;  %v867_v55 = vshll.u32 %v3642_v45, 16 }
 0x137   : > { %v1072_v26 = vmul.f32 %v1071_v31, %v1069_v30  ;;  %v1079_v43 = vmul.f32 %v1078_v19, %v1069_v30  ;;  %vm1705_vm13 = vcmp.eq.s32.totalorder %v3560_v44, 0  ;;  %vm1708_vm14 = vcmp.eq.s32.totalorder %v3560_v44, 2 }
 0x138   : > { %v1985_v37 = vmul.f32 %v1981_v51, %v3470_v7  ;;  %v1994_v61 = vmul.f32 %v1981_v51, %v3540_v46  ;;  %v854_v53 = vadd.s32 %v852_v48, %v850_v56  ;;  %vm869_vm15 = vc.u32 %v861_v39, %v865_v36 }
 0x139   : > { %v1073_v24 = vadd.f32 -0.4999988, %v1072_v26  ;;  %v1080_v23 = vadd.f32 -0.16666654, %v1079_v43  ;;  %vm1087_vm0 = vcmp.lt.s32.totalorder %v3558_v8, 2  ;;  %vm1704_vm1 = vcmp.lt.s32.totalorder %v3560_v44, 2 }
 0x13a   : > { %2569 = vst [vmem:[%s3546_s29 + $0xe0] sm:$0xff] %v1985_v37  ;;  %v1998_v10 = vsub.f32 %v1994_v61, %v1964_v38  ;;  %v871_v38 = vadd.s32 %v865_v36, %v861_v39  ;;  %v855_v63 = vadd.s32 %v854_v53, %v844_v4  ;;  %v870_v59 = vsel %vm869_vm15, 1, %v2930_v0 }
 0x13b   : > { %v1074_v21 = vmul.f32 %v1073_v24, %v1069_v30  ;;  %v1081_v33 = vmul.f32 %v1080_v23, %v1069_v30  ;;  %vm1084_vm3 = vweird.f32 %v3292_v28  ;;  %v866_v58 = vshrl.u32 %v3639_v35, 16 }
 0x13c   : > { %v2002_v32 = vmul.f32 %v1998_v10, %v3470_v7  ;;  %v2011_v15 = vmul.f32 %v1998_v10, %v3540_v46  ;;  %v872_v41 = vadd.s32 %v870_v59, %v864_v62  ;;  %vm873_vm5 = vc.u32 %v871_v38, %v867_v55 }
 0x13d   : > { %v1075_v3 = vadd.f32 1.0, %v1074_v21  ;;  %v1082_v39 = vadd.f32 1.0, %v1081_v33  ;;  %v3665_v40 = vadd.s32 %v855_v63, %v846_v11  ;;  %v874_v30 = vsel %vm873_vm5, 1, %v2930_v0 }
 0x13e   : > { %2573 = vst [vmem:[%s3546_s29 + $0x100] sm:$0xff] %v2002_v32  ;;  %v2015_v20 = vsub.f32 %v2011_v15, %v1981_v51  ;;  %v876_v31 = vadd.s32 %v874_v30, %v872_v41  ;;  %v426_v51 = vmul.f32 %v3609_v29, %v3563_v13  ;;  %vm1088_vm6 = vcmp.eq.s32.totalorder %v3558_v8, 0 }
 0x13f   : > { %v1083_v19 = vmul.f32 %v1082_v39, %v3621_v14  ;;  %v1092_v35 = vxor.u32 2147483648, %v1075_v3  ;;  %v3674_v27 = vadd.s32 %v871_v38, %v867_v55  ;;  %v868_v61 = vshrl.u32 %v3642_v45, 16 }
 0x140   : > { %v2019_v17 = vmul.f32 %v2015_v20, %v3470_v7  ;;  %v2028_v4 = vmul.f32 %v2015_v20, %v3540_v46  ;;  %v877_v18 = vadd.s32 %v876_v31, %v866_v58  ;;  %v427_v36 = vmul.f32 %v3609_v29, %v426_v51 }
 0x141   : > { %v1089_v26 = vxor.u32 2147483648, %v1083_v19  ;;  %vm1091_vm2 = vcmp.eq.s32.totalorder %v3558_v8, 2  ;;  %v825_v14 = vsel %vm819_vm11, %v3625_v6, %v3629_v16  ;;  %vm881_vm4 = vc.u32 %v3665_v40, %v3674_v27 }
 0x142   : > { %2577 = vst [vmem:[%s3546_s29 + $0x120] sm:$0xff] %v2019_v17  ;;  %v2032_v37 = vsub.f32 %v2028_v4, %v1998_v10  ;;  %v878_v10 = vadd.s32 %v877_v18, %v868_v61  ;;  %v428_v45 = vmul.f32 0.5, %v427_v36  ;;  %v1093_v48 = vsel %vm1091_vm2, %v1092_v35, %v1083_v19 }
 0x143   : > { %v1090_v11 = vsel %vm1088_vm6, %v1075_v3, %v1089_v26  ;;  %v1707_v62 = vsel %vm1705_vm13, %v1075_v3, %v1089_v26  ;;  %v1710_v57 = vsel %vm1708_vm14, %v1092_v35, %v1083_v19  ;;  %v879_v32 = vmul.u32 %v3552_v22, %v825_v14 }
 0x144   : > { %v2036_v43 = vmul.f32 %v2032_v37, %v3470_v7  ;;  %v2045_v56 = vmul.f32 %v2032_v37, %v3540_v46  ;;  %v1094_v16 = vsel %vm1087_vm0, %v1090_v11, %v1093_v48  ;;  %v1711_v24 = vsel %vm1704_vm1, %v1707_v62, %v1710_v57 }
 0x145   : > { %v882_v23 = vadd.s32 1, %v878_v10  ;;  %v1095_v53 = vsel %vm1084_vm3, nan, %v1094_v16  ;;  %v1712_v55 = vsel %vm1084_vm3, nan, %v1711_v24  ;;  %v429_v15 = vsub.f32 1.5, %v428_v45 }
 0x146   : > { %2581 = vst [vmem:[%s3546_s29 + $0x140] sm:$0xff] %v2036_v43  ;;  %v2049_v6 = vsub.f32 %v2045_v56, %v2015_v20  ;;  %v3706_v8 = vmul.f32 2.0, %v1712_v55  ;;  %v1873_v44 = vmul.f32 %v1095_v53, %v3550_v2  ;;  %vm432_vm7 = vcmp.eq.f32.partialorder %v3563_v13, inf }
 0x147   : > { %v883_v33 = vsel %vm881_vm4, %v882_v23, %v878_v10  ;;  %v430_v63 = vmul.f32 %v3609_v29, %v429_v15  ;;  %v435_v58 = vand.u32 2147483648, %v3563_v13  ;;  %vm434_vm8 = vcmp.eq.f32.partialorder %v3563_v13, 0.0 }
 0x148   : > { %v2053_v38 = vmul.f32 %v2049_v6, %v3470_v7  ;;  %v2062_v21 = vmul.f32 %v2049_v6, %v3540_v46  ;;  %v1881_v22 = vmul.f32 %v3706_v8, %v1095_v53  ;;  %v884_v59 = vadd.s32 %v883_v33, %v879_v32  ;;  %1877 = vst [vmem:[%s3546_s29 + $0x10] sm:$0xff] %v1873_v44 }
 0x149   : > { %v431_v20 = vmul.f32 %v430_v63, %v3563_v13  ;;  %vm440_vm15 = vcmp.gt.f32.partialorder %v3563_v13, 0.0  ;;  %vm544_vm0 = vcmp.lt.f32.partialorder %v3373_v47, 3.5  ;;  %vm548_vm1 = vcmp.gt.f32.partialorder %v3373_v47, 0.0 }
 0x14a   : > { %2585 = vst [vmem:[%s3546_s29 + $0x160] sm:$0xff] %v2053_v38  ;;  %v2066_v28 = vsub.f32 %v2062_v21, %v2032_v37  ;;  %v1885_v29 = vmul.f32 %v1881_v22, %v3550_v2  ;;  %v1894_v39 = vmul.f32 %v1881_v22, %v3706_v8  ;;  %v885_v30 = vadd.s32 536870912, %v884_v59  ;;  %vm3828_vm6 = vmand %vm544_vm0, %vm548_vm1 }
 0x14b   : > { %v433_v17 = vsel %vm432_vm7, %v3563_v13, %v431_v20  ;;  %vm788_vm3 = vcmp.lt.s32.totalorder %v3488_v52, 0  ;;  %vm586_vm5 = vweird.f32 %v3373_v47  ;;  %vm787_vm4 = vcmp.le.f32.partialorder %v786_v12, 0.7853982 }
 0x14c   : > { %v2070_v41 = vmul.f32 %v2066_v28, %v3470_v7  ;;  %v2079_v3 = vmul.f32 %v2066_v28, %v3540_v46  ;;  %v1898_v31 = vsub.f32 %v1894_v39, %v1095_v53  ;;  %v3726_v51 = vsel %vm434_vm8, %v435_v58, %v433_v17  ;;  %2547 = vst [vmem:[%s3546_s29 + $0x30] sm:$0xff] %v1885_v29 }
 0x14d   : > { %v3729_v19 = vshrl.u32 %v885_v30, 30  ;;  %2808 = vrcp.f32 %v3726_v51  ;;  %508 = vst [vmem:[%s3283_s27 + $0x18] sm:$0xff] %v3726_v51  ;;  %v495_v21 = vand.u32 2147483647, %v3726_v51  ;;  %vm491_vm11 = vweird.f32 %v3726_v51  ;;  %s2828_s27 = sshra.s32 %s2228_s11, 4  ;;  %s2829_s27 = int_to_ptr.hbm [resolvable:$true] %s2828_s27 }
 0x14e   : > { %2589 = vst [vmem:[%s3546_s29 + $0x180] sm:$0xff] %v2070_v41  ;;  %v2083_v4 = vsub.f32 %v2079_v3, %v2049_v6  ;;  %v1902_v61 = vmul.f32 %v1898_v31, %v3550_v2  ;;  %v1911_v18 = vmul.f32 %v1898_v31, %v3706_v8  ;;  %2810 = vrcp.f32 %v3373_v47  ;;  %s2830_s13 = scalar_lea.hbm %s2829_s27, 32  ;;  %p2835_p6 = scmp.lt.s32.totalorder %s2829_s27, %s4258_s2 }
 0x14f   : > { %v887_v36 = vshll.u32 %v3729_v19, 30  ;;  %v497_v20 = vand.u32 2147483648, %v3726_v51  ;;  %vm3773_vm13 = vcmp.eq.f32.partialorder %v495_v21, 8.507059e+37  ;;  %vm929_vm0 = vweird.f32 %v3488_v52  ;;  %p2831_p2 = scmp.ne.s32.totalorder %s2829_s27, %s2830_s13  ;;  %p2836_p8 = scmp.lt.s32.totalorder %s2834_s8, %s2830_s13 }
 0x150   : > { %v2087_v35 = vmul.f32 %v2083_v4, %v3470_v7  ;;  %v2096_v37 = vmul.f32 %v2083_v4, %v3540_v46  ;;  %v1915_v14 = vsub.f32 %v1911_v18, %v1881_v22  ;;  %2551 = vst [vmem:[%s3546_s29 + $0x50] sm:$0xff] %v1902_v61  ;;  %v880_v22 = vadd.s32 %v3674_v27, %v3665_v40 }
 0x151   : > { %v3742_v43 = vsub.s32 %v884_v59, %v887_v36  ;;  %v498_v61 = vor.u32 1.1754944e-38, %v497_v20  ;;  %p2832_p3 = pnand %p2831_p2, %p3048_p5  ;;  %p2837_p9 = por %p2836_p8, %p2835_p6 }
 0x152   : > { %2593 = vst [vmem:[%s3546_s29 + $0x1a0] sm:$0xff] %v2087_v35  ;;  %v2100_v26 = vsub.f32 %v2096_v37, %v2066_v28  ;;  %v1919_v45 = vmul.f32 %v1915_v14, %v3550_v2  ;;  %v1928_v11 = vmul.f32 %v1915_v14, %v3706_v8 }
 0x153   : > { %v2809_v48 = vpop.eup %2808  ;;  %vm889_vm10 = vcmp.lt.s32.totalorder %v3742_v43, 0  ;;  %v890_v62 = vsub.s32 0, %v3742_v43  ;;  %p2833_p4 = pneg %p2832_p3 }
 0x154   : > { %v2104_v56 = vmul.f32 %v2100_v26, %v3470_v7  ;;  %v2113_v10 = vmul.f32 %v2100_v26, %v3540_v46  ;;  %v1932_v6 = vsub.f32 %v1928_v11, %v1898_v31  ;;  %v3751_v16 = vpop.eup %2810  ;;  %2555 = vst [vmem:[%s3546_s29 + $0x70] sm:$0xff] %v1919_v45  ;;  %v487_v23 = vmul.f32 %v2809_v48, %v3726_v51 }
 0x155   : > { %v891_v24 = vsel %vm889_vm10, %v890_v62, %v3742_v43  ;;  %v582_v63 = vmul.f32 %v3751_v16, %v3373_v47  ;;  %vm492_vm12 = vweird.f32 %v2809_v48  ;;  %vm587_vm2 = vweird.f32 %v3751_v16  ;;  %p2838_p10 = pnand %p2837_p9, %p2833_p4 }
 0x156   : > { %2597 = vst [vmem:[%s3546_s29 + $0x1c0] sm:$0xff] %v2104_v56  ;;  %v2117_v57 = vsub.f32 %v2113_v10, %v2083_v4  ;;  %v1936_v32 = vmul.f32 %v1932_v6, %v3550_v2  ;;  %v1945_v15 = vmul.f32 %v1932_v6, %v3706_v8  ;;  %v892_v38 = vclz %v891_v24  ;;  %vm493_vm14 = vmor %vm491_vm11, %vm492_vm12 }
 0x157   : > { %v488_v28 = vsub.f32 1.0, %v487_v23  ;;  %v538_v4 = vadd.f32 1e-11, %v3726_v51  ;;  %v583_v24 = vsub.f32 1.0, %v582_v63  ;;  %vm3852_vm7 = vmor %vm586_vm5, %vm587_vm2 }
 0x158   : > { %v2121_v53 = vmul.f32 %v2117_v57, %v3470_v7  ;;  %v2130_v55 = vmul.f32 %v2117_v57, %v3540_v46  ;;  %v1949_v33 = vsub.f32 %v1945_v15, %v1915_v14  ;;  %2559 = vst [vmem:[%s3546_s29 + $0x90] sm:$0xff] %v1936_v32  ;;  %v2525_v59 = vadd.s32 4294967294, %v892_v38 }
 0x159   : > { %v489_v39 = vmul.f32 %v2809_v48, %v488_v28  ;;  %v3799_v21 = vadd.f32 0.5, %v538_v4  ;;  %v584_v63 = vmul.f32 %v3751_v16, %v583_v24  ;;  %v590_v4 = vand.u32 2147483647, %v3373_v47 }
 0x15a   : > { %2601 = vst [vmem:[%s3546_s29 + $0x1e0] sm:$0xff] %v2121_v53  ;;  %v2134_v44 = vsub.f32 %v2130_v55, %v2100_v26  ;;  %v1953_v3 = vmul.f32 %v1949_v33, %v3550_v2  ;;  %v1962_v29 = vmul.f32 %v1949_v33, %v3706_v8  ;;  %vm2526_vm9 = vcmp.lt.s32.totalorder %v2525_v59, 0 }
 0x15b   : > { %v895_v17 = vsel %vm2526_vm9, 0, %v2525_v59  ;;  %v490_v37 = vadd.f32 %v2809_v48, %v489_v39  ;;  %v585_v39 = vadd.f32 %v3751_v16, %v584_v63  ;;  %vm591_vm8 = vcmp.eq.f32.partialorder %v590_v4, 8.507059e+37 }
 0x15c   : > { %v2138_v58 = vmul.f32 %v2134_v44, %v3470_v7  ;;  %v2147_v41 = vmul.f32 %v2134_v44, %v3540_v46  ;;  %v1966_v27 = vsub.f32 %v1962_v29, %v1932_v6  ;;  %2563 = vst [vmem:[%s3546_s29 + $0xb0] sm:$0xff] %v1953_v3  ;;  %v896_v31 = vsub.s32 32, %v895_v17 }
 0x15d   : > { %v900_v35 = vsub.s32 4294967266, %v895_v17  ;;  %v897_v56 = vshll.u32 %v3742_v43, %v895_v17  ;;  %v494_v11 = vsel %vm493_vm14, %v2809_v48, %v490_v37 }
 0x15e   : > { %2605 = vst [vmem:[%s3546_s29 + $0x200] sm:$0xff] %v2138_v58  ;;  %v2151_v40 = vsub.f32 %v2147_v41, %v2117_v57  ;;  %v1970_v26 = vmul.f32 %v1966_v27, %v3550_v2  ;;  %v1979_v14 = vmul.f32 %v1966_v27, %v3706_v8  ;;  %v898_v10 = vshrl.u32 %v880_v22, %v896_v31 }
 0x15f   : > { %v901_v45 = vadd.s32 127, %v900_v35  ;;  %v499_v6 = vsel %vm3773_vm13, %v498_v61, %v494_v11  ;;  %v3815_v41 = vmul.f32 0.8975979, %v3799_v21 }
 0x160   : > { %v2155_v18 = vmul.f32 %v2151_v40, %v3470_v7  ;;  %v2164_v36 = vmul.f32 %v2151_v40, %v3540_v46  ;;  %v1983_v57 = vsub.f32 %v1979_v14, %v1949_v33  ;;  %2567 = vst [vmem:[%s3546_s29 + $0xd0] sm:$0xff] %v1970_v26  ;;  %v899_v23 = vor.u32 %v898_v10, %v897_v56 }
 0x161   : > { %v902_v51 = vshll.u32 %v901_v45, 23  ;;  %v504_v53 = vsel %vm440_vm15, %v499_v6, 0.0  ;;  %v1096_v17 = vand.u32 2147483647, %v3815_v41  ;;  %v589_v26 = vsel %vm3852_vm7, %v3751_v16, %v585_v39 }
 0x162   : > { %2609 = vst [vmem:[%s3546_s29 + $0x220] sm:$0xff] %v2155_v18  ;;  %v2168_v62 = vsub.f32 %v2164_v36, %v2134_v44  ;;  %v1987_v48 = vmul.f32 %v1983_v57, %v3550_v2  ;;  %v1996_v32 = vmul.f32 %v1983_v57, %v3706_v8  ;;  %v512_v13 = vmul.f32 %v504_v53, %v3106_v25 }
 0x163   : > { %v903_v15 = vor.u32 4788187, %v902_v51  ;;  %v520_v38 = vmul.f32 %v504_v53, %v3114_v34  ;;  %v906_v28 = vcvt.s32.f32 %v899_v23  ;;  %v529_v20 = vmul.f32 %v504_v53, %v3517_v50 }
 0x164   : > { %v2172_v43 = vmul.f32 %v2168_v62, %v3470_v7  ;;  %v2181_v55 = vmul.f32 %v2168_v62, %v3540_v46  ;;  %v2000_v33 = vsub.f32 %v1996_v32, %v1966_v27  ;;  %v910_v46 = vsub.s32 4, %v3729_v19  ;;  %2571 = vst [vmem:[%s3546_s29 + $0xf0] sm:$0xff] %v1987_v48 }
 0x165   : > { %v904_v25 = vand.u32 2147483647, %v903_v15  ;;  %516 = vst [vmem:[%s3192_s25 + $0x18] sm:$0xff] %v512_v13  ;;  %v2518_v18 = vsel %vm3828_vm6, 1.0, %v2939_v42 }
 0x166   : > { %2613 = vst [vmem:[%s3546_s29 + $0x240] sm:$0xff] %v2172_v43  ;;  %v2185_v44 = vsub.f32 %v2181_v55, %v2151_v40  ;;  %v2004_v22 = vmul.f32 %v2000_v33, %v3550_v2  ;;  %v2013_v59 = vmul.f32 %v2000_v33, %v3706_v8  ;;  %v911_v29 = vsel %vm788_vm3, %v910_v46, %v3729_v19 }
 0x167   : > { %v907_v58 = vmul.f32 %v906_v28, %v904_v25  ;;  %2508 = vst [vmem:[%s3192_s25 + $0x38] sm:$0xff] %v520_v38  ;;  %v1099_v40 = vand.u32 2139095040, %v3815_v41  ;;  %v913_v35 = vsel %vm787_vm4, 0, %v911_v29  ;;  %v564_v51 = vmul.f32 0.75592893, %v2518_v18 }
 0x168   : > { %v2189_v34 = vmul.f32 %v2185_v44, %v3470_v7  ;;  %v2017_v3 = vsub.f32 %v2013_v59, %v1983_v57  ;;  %v592_v7 = vand.u32 2147483648, %v3373_v47  ;;  %2575 = vst [vmem:[%s3546_s29 + $0x110] sm:$0xff] %v2004_v22  ;;  %v930_v62 = vadd.s32 3, %v913_v35 }
 0x169   : > { %v908_v30 = vxor.u32 2147483648, %v907_v58  ;;  %2512 = vst [vmem:[%s3192_s25 + $0x58] sm:$0xff] %v529_v20  ;;  %v1100_v37 = vshrl.u32 %v1099_v40, 23  ;;  %v1103_v47 = vand.u32 8388607, %v1096_v17  ;;  %v3865_v55 = vand.u32 3, %v913_v35 }
 0x16a   : > { %2617 = vst [vmem:[%s3546_s29 + $0x260] sm:$0xff] %v2189_v34  ;;  %v2021_v27 = vmul.f32 %v2017_v3, %v3550_v2  ;;  %v2030_v19 = vmul.f32 %v2017_v3, %v3706_v8  ;;  %v593_v14 = vor.u32 1.1754944e-38, %v592_v7  ;;  %v931_v15 = vand.u32 3, %v930_v62 }
 0x16b   : > { %v909_v31 = vsel %vm788_vm3, %v908_v30, %v907_v58  ;;  %v2530_v10 = vadd.s32 4294967169, %v1100_v37  ;;  %vm1551_vm9 = vcmp.eq.s32.totalorder %v3865_v55, 0  ;;  %vm1554_vm12 = vcmp.eq.s32.totalorder %v3865_v55, 2 }
 0x16c   : > { %2579 = vst [vmem:[%s3546_s29 + $0x130] sm:$0xff] %v2021_v27  ;;  %v2034_v61 = vsub.f32 %v2030_v19, %v2000_v33  ;;  %v912_v36 = vsel %vm787_vm4, %v3488_v52, %v909_v31  ;;  %v594_v16 = vsel %vm591_vm8, %v593_v14, %v589_v26  ;;  %v1104_v33 = vor.u32 8388608, %v1103_v47 }
 0x16d   : > { %v914_v56 = vmul.f32 %v912_v36, %v912_v36  ;;  %v1106_v24 = vadd.s32 1, %v2530_v10  ;;  %v3870_v25 = vmul.f32 %v594_v16, %v564_v51  ;;  %vm933_vm11 = vcmp.eq.s32.totalorder %v931_v15, 0 }
 0x16e   : > { %v2038_v45 = vmul.f32 %v2034_v61, %v3550_v2  ;;  %v2047_v11 = vmul.f32 %v2034_v61, %v3706_v8  ;;  %vm932_vm13 = vcmp.lt.s32.totalorder %v931_v15, 2  ;;  %vm936_vm14 = vcmp.eq.s32.totalorder %v931_v15, 2 }
 0x16f   : > { %v915_v57 = vmul.f32 -0.001358992, %v914_v56  ;;  %v922_v6 = vmul.f32 -0.00019511016, %v914_v56  ;;  %vm1107_vm10 = vcmp.gt.s32.totalorder %v1106_v24, 0  ;;  %vm1550_vm15 = vcmp.lt.s32.totalorder %v3865_v55, 2 }
 0x170   : > { %2583 = vst [vmem:[%s3546_s29 + $0x150] sm:$0xff] %v2038_v45  ;;  %v2051_v23 = vsub.f32 %v2047_v11, %v2017_v3  ;;  %v1108_v13 = vsel %vm1107_vm10, %v1106_v24, 0  ;;  %v3879_v7 = vshll.u32 %v1104_v33, 8 }
 0x171   : > { %v916_v53 = vadd.f32 0.041655596, %v915_v57  ;;  %v923_v43 = vadd.f32 0.008332121, %v922_v6  ;;  %v1110_v46 = vand.u32 31, %v1108_v13  ;;  %v3883_v50 = vshrl.u32 %v1108_v13, 5 }
 0x172   : > { %v2055_v48 = vmul.f32 %v2051_v23, %v3550_v2  ;;  %v2064_v32 = vmul.f32 %v2051_v23, %v3706_v8 }
 0x173   : > { %v917_v38 = vmul.f32 %v916_v53, %v914_v56  ;;  %v924_v44 = vmul.f32 %v923_v43, %v914_v56  ;;  %v3872_v22 = vsub.s32 32, %v1110_v46  ;;  %v1113_v37 = vshll.u32 %v2933_v49, %v1110_v46 }
 0x174   : > { %2587 = vst [vmem:[%s3546_s29 + $0x170] sm:$0xff] %v2055_v48  ;;  %v2068_v63 = vsub.f32 %v2064_v32, %v2034_v61  ;;  %v1116_v61 = vshll.u32 %v2934_v54, %v1110_v46  ;;  %v1119_v26 = vshll.u32 %v2935_v60, %v1110_v46  ;;  %v1122_v14 = vshll.u32 %v2936_v1, %v1110_v46 }
 0x175   : > { %v918_v28 = vadd.f32 -0.4999988, %v917_v38  ;;  %v925_v34 = vadd.f32 -0.16666654, %v924_v44  ;;  %v1114_v39 = vshrl.u32 %v2934_v54, %v3872_v22  ;;  %v1117_v30 = vshrl.u32 %v2935_v60, %v3872_v22 }
 0x176   : > { %v2072_v59 = vmul.f32 %v2068_v63, %v3550_v2  ;;  %v2081_v20 = vmul.f32 %v2068_v63, %v3706_v8  ;;  %v1120_v19 = vshrl.u32 %v2936_v1, %v3872_v22  ;;  %v1123_v4 = vshrl.u32 %v2937_v5, %v3872_v22 }
 0x177   : > { %v919_v58 = vmul.f32 %v918_v28, %v914_v56  ;;  %v926_v3 = vmul.f32 %v925_v34, %v914_v56  ;;  %v3900_v10 = vor.u32 %v1114_v39, %v1113_v37  ;;  %v3902_v45 = vor.u32 %v1117_v30, %v1116_v61 }
 0x178   : > { %2591 = vst [vmem:[%s3546_s29 + $0x190] sm:$0xff] %v2072_v59  ;;  %v2085_v29 = vsub.f32 %v2081_v20, %v2051_v23  ;;  %v1126_v11 = vshrl.u32 %v2938_v9, %v3872_v22  ;;  %v3906_v47 = vor.u32 %v1120_v19, %v1119_v26  ;;  %v1124_v54 = vor.u32 %v1123_v4, %v1122_v14 }
 0x179   : > { %v920_v40 = vadd.f32 1.0, %v919_v58  ;;  %v927_v27 = vadd.f32 1.0, %v926_v3  ;;  %vm1128_vm1 = vcmp.lt.s32.totalorder %v3883_v50, 1  ;;  %vm1129_vm3 = vcmp.lt.s32.totalorder %v3883_v50, 2 }
 0x17a   : > { %v2089_v31 = vmul.f32 %v2085_v29, %v3550_v2  ;;  %v2098_v35 = vmul.f32 %v2085_v29, %v3706_v8  ;;  %vm1131_vm5 = vcmp.lt.s32.totalorder %v3883_v50, 4  ;;  %v1136_v48 = vsel %vm1128_vm1, %v3900_v10, %v3902_v45 }
 0x17b   : > { %v928_v18 = vmul.f32 %v927_v27, %v912_v36  ;;  %v937_v12 = vxor.u32 2147483648, %v920_v40  ;;  %v1125_v36 = vshll.u32 %v2937_v5, %v1110_v46  ;;  %vm1130_vm6 = vcmp.lt.s32.totalorder %v3883_v50, 3 }
 0x17c   : > { %2595 = vst [vmem:[%s3546_s29 + $0x1b0] sm:$0xff] %v2089_v31  ;;  %v2102_v56 = vsub.f32 %v2098_v35, %v2068_v63  ;;  %v1137_v52 = vsel %vm1131_vm5, %v1124_v54, 920167782  ;;  %v1140_v38 = vsel %vm1128_vm1, %v3902_v45, %v3906_v47  ;;  %v1145_v39 = vand.u32 65535, %v3879_v7 }
 0x17d   : > { %v934_v62 = vxor.u32 2147483648, %v928_v18  ;;  %v938_v57 = vsel %vm936_vm14, %v937_v12, %v928_v18  ;;  %v1556_v9 = vsel %vm1554_vm12, %v937_v12, %v928_v18  ;;  %v1127_v23 = vor.u32 %v1126_v11, %v1125_v36 }
 0x17e   : > { %v2106_v60 = vmul.f32 %v2102_v56, %v3550_v2  ;;  %v2115_v1 = vmul.f32 %v2102_v56, %v3706_v8  ;;  %v1138_v63 = vsel %vm1130_vm6, %v3906_v47, %v1137_v52  ;;  %v1146_v30 = vshrl.u32 %v3879_v7, 16 }
 0x17f   : > { %v935_v6 = vsel %vm933_vm11, %v920_v40, %v934_v62  ;;  %v1553_v24 = vsel %vm1551_vm9, %v920_v40, %v934_v62  ;;  %v1141_v44 = vsel %vm1131_vm5, %v1127_v23, 1326507024  ;;  %v1139_v34 = vsel %vm1129_vm3, %v1136_v48, %v1138_v63 }
 0x180   : > { %2599 = vst [vmem:[%s3546_s29 + $0x1d0] sm:$0xff] %v2106_v60  ;;  %v2119_v51 = vsub.f32 %v2115_v1, %v2085_v29  ;;  %v939_v5 = vsel %vm932_vm13, %v935_v6, %v938_v57  ;;  %v1557_v16 = vsel %vm1550_vm15, %v1553_v24, %v1556_v9  ;;  %v1142_v28 = vsel %vm1130_vm6, %v1124_v54, %v1141_v44 }
 0x181   : > { %v940_v53 = vsel %vm929_vm0, nan, %v939_v5  ;;  %v1558_v43 = vsel %vm929_vm0, nan, %v1557_v16  ;;  %v1143_v59 = vsel %vm1129_vm3, %v1140_v38, %v1142_v28  ;;  %v1170_v31 = vshrl.u32 %v1139_v34, 16 }
 0x182   : > { %v2123_v32 = vmul.f32 %v2119_v51, %v3550_v2  ;;  %v2132_v55 = vmul.f32 %v2119_v51, %v3706_v8  ;;  %v3934_v15 = vmul.f32 2.0, %v1558_v43  ;;  %v1872_v13 = vmul.f32 %v940_v53, %v3870_v25 }
 0x183   : > { %v1147_v40 = vand.u32 65535, %v1143_v59  ;;  %v1148_v27 = vshrl.u32 %v1143_v59, 16  ;;  %v1169_v61 = vand.u32 65535, %v1139_v34  ;;  %v1172_v1 = vmul.u32 %v1170_v31, %v1145_v39 }
 0x184   : > { %2603 = vst [vmem:[%s3546_s29 + $0x1f0] sm:$0xff] %v2123_v32  ;;  %v2136_v33 = vsub.f32 %v2132_v55, %v2102_v56  ;;  %v1880_v46 = vmul.f32 %v3934_v15, %v940_v53  ;;  %v1174_v52 = vmul.u32 %v1170_v31, %v1146_v30  ;;  %v1133_v28 = vsel %vm1131_vm5, %v3906_v47, 2102212464 }
 0x185   : > { %1876 = vst [vmem:[%s3546_s29 + $0x8] sm:$0xff] %v1872_v13  ;;  %v1150_v35 = vmul.u32 %v1148_v27, %v1145_v39  ;;  %v1151_v37 = vmul.u32 %v1147_v40, %v1146_v30  ;;  %v1149_v56 = vmul.u32 %v1147_v40, %v1145_v39  ;;  %v1152_v11 = vmul.u32 %v1148_v27, %v1146_v30 }
 0x186   : > { %v2140_v20 = vmul.f32 %v2136_v33, %v3550_v2  ;;  %v2149_v58 = vmul.f32 %v2136_v33, %v3706_v8  ;;  %v1884_v3 = vmul.f32 %v1880_v46, %v3870_v25  ;;  %v1893_v29 = vmul.f32 %v1880_v46, %v3934_v15 }
 0x187   : > { %v1153_v62 = vshll.u32 %v1150_v35, 16  ;;  %v1154_v60 = vshrl.u32 %v1150_v35, 16  ;;  %v1155_v57 = vshll.u32 %v1151_v37, 16  ;;  %v1173_v24 = vmul.u32 %v1169_v61, %v1146_v30 }
 0x188   : > { %2607 = vst [vmem:[%s3546_s29 + $0x210] sm:$0xff] %v2140_v20  ;;  %v2153_v19 = vsub.f32 %v2149_v58, %v2119_v51  ;;  %v1897_v4 = vsub.f32 %v1893_v29, %v940_v53  ;;  %v1171_v53 = vmul.u32 %v1169_v61, %v1145_v39  ;;  %v1175_v43 = vshll.u32 %v1172_v1, 16 }
 0x189   : > { %2546 = vst [vmem:[%s3546_s29 + $0x28] sm:$0xff] %v1884_v3  ;;  %vm1157_vm2 = vc.u32 %v1149_v56, %v1153_v62  ;;  %v1159_v6 = vadd.s32 %v1153_v62, %v1149_v56  ;;  %v1156_v29 = vshrl.u32 %v1151_v37, 16  ;;  %v1176_v47 = vshrl.u32 %v1172_v1, 16 }
 0x18a   : > { %v2157_v18 = vmul.f32 %v2153_v19, %v3550_v2  ;;  %v2166_v12 = vmul.f32 %v2153_v19, %v3706_v8  ;;  %v1901_v26 = vmul.f32 %v1897_v4, %v3870_v25  ;;  %v1910_v14 = vmul.f32 %v1897_v4, %v3934_v15 }
 0x18b   : > { %v1158_v16 = vsel %vm1157_vm2, 1, %v2930_v0  ;;  %vm1161_vm4 = vc.u32 %v1159_v6, %v1155_v57  ;;  %vm1179_vm7 = vc.u32 %v1171_v53, %v1175_v43  ;;  %v1181_v38 = vadd.s32 %v1175_v43, %v1171_v53 }
 0x18c   : > { %2611 = vst [vmem:[%s3546_s29 + $0x230] sm:$0xff] %v2157_v18  ;;  %v2170_v54 = vsub.f32 %v2166_v12, %v2136_v33  ;;  %v1914_v36 = vsub.f32 %v1910_v14, %v1880_v46  ;;  %v1160_v55 = vadd.s32 %v1158_v16, %v1152_v11  ;;  %v1162_v13 = vsel %vm1161_vm4, 1, %v2930_v0 }
 0x18d   : > { %2550 = vst [vmem:[%s3546_s29 + $0x48] sm:$0xff] %v1901_v26  ;;  %v1180_v34 = vsel %vm1179_vm7, 1, %v2930_v0 }
 0x18e   : > { %v2174_v9 = vmul.f32 %v2170_v54, %v3550_v2  ;;  %v2183_v23 = vmul.f32 %v2170_v54, %v3706_v8  ;;  %v1918_v51 = vmul.f32 %v1914_v36, %v3870_v25  ;;  %v1927_v5 = vmul.f32 %v1914_v36, %v3934_v15 }
 0x18f   : > { %v1177_v8 = vshll.u32 %v1173_v24, 16  ;;  %v1164_v63 = vadd.s32 %v1162_v13, %v1160_v55  ;;  %v1182_v58 = vadd.s32 %v1180_v34, %v1174_v52 }
 0x190   : > { %2615 = vst [vmem:[%s3546_s29 + $0x250] sm:$0xff] %v2174_v9  ;;  %v2187_v48 = vsub.f32 %v2183_v23, %v2153_v19  ;;  %v1931_v32 = vsub.f32 %v1927_v5, %v1897_v4 }
 0x191   : > { %2554 = vst [vmem:[%s3546_s29 + $0x68] sm:$0xff] %v1918_v51  ;;  %vm1183_vm8 = vc.u32 %v1181_v38, %v1177_v8  ;;  %v1165_v20 = vadd.s32 %v1164_v63, %v1154_v60  ;;  %v4003_v31 = vadd.s32 %v1181_v38, %v1177_v8 }
 0x192   : > { %v2191_v44 = vmul.f32 %v2187_v48, %v3550_v2  ;;  %v1935_v33 = vmul.f32 %v1931_v32, %v3870_v25  ;;  %v1944_v46 = vmul.f32 %v1931_v32, %v3934_v15  ;;  %v1184_v3 = vsel %vm1183_vm8, 1, %v2930_v0 }
 0x193   : > { %v1112_v2 = vshrl.u32 %v2933_v49, %v3872_v22  ;;  %v1186_v40 = vadd.s32 %v1184_v3, %v1182_v58  ;;  %v1134_v0 = vsel %vm1130_vm6, %v3902_v45, %v1133_v28  ;;  %v4000_v19 = vadd.s32 %v1165_v20, %v1156_v29 }
 0x194   : > { %2619 = vst [vmem:[%s3546_s29 + $0x270] sm:$0xff] %v2191_v44  ;;  %v1948_v59 = vsub.f32 %v1944_v46, %v1914_v36  ;;  %v1178_v22 = vshrl.u32 %v1173_v24, 16 }
 0x195   : > { %2558 = vst [vmem:[%s3546_s29 + $0x88] sm:$0xff] %v1935_v33  ;;  %v1132_v27 = vsel %vm1128_vm1, %v1112_v2, %v3900_v10  ;;  %v1187_v4 = vadd.s32 %v1186_v40, %v1176_v47  ;;  %vm1191_vm10 = vc.u32 %v4000_v19, %v4003_v31 }
 0x196   : > { %v1952_v39 = vmul.f32 %v1948_v59, %v3870_v25  ;;  %v1961_v30 = vmul.f32 %v1948_v59, %v3934_v15  ;;  %v1135_v10 = vsel %vm1129_vm3, %v1132_v27, %v1134_v0 }
 0x197   : > { %v1188_v45 = vadd.s32 %v1187_v4, %v1178_v22  ;;  %v1189_v12 = vmul.u32 %v3879_v7, %v1135_v10 }
 0x198   : > { %2562 = vst [vmem:[%s3546_s29 + $0xa8] sm:$0xff] %v1952_v39  ;;  %v1965_v49 = vsub.f32 %v1961_v30, %v1931_v32 }
 0x199   : > { %v1192_v18 = vadd.s32 1, %v1188_v45 }
 0x19a   : > { %v1969_v35 = vmul.f32 %v1965_v49, %v3870_v25  ;;  %v1978_v37 = vmul.f32 %v1965_v49, %v3934_v15 }
 0x19b   : > { %v1193_v56 = vsel %vm1191_vm10, %v1192_v18, %v1188_v45 }
 0x19c   : > { %2566 = vst [vmem:[%s3546_s29 + $0xc8] sm:$0xff] %v1969_v35  ;;  %v1982_v61 = vsub.f32 %v1978_v37, %v1948_v59  ;;  %v1194_v11 = vadd.s32 %v1193_v56, %v1189_v12 }
 0x19e   : > { %v1986_v26 = vmul.f32 %v1982_v61, %v3870_v25  ;;  %v1995_v14 = vmul.f32 %v1982_v61, %v3934_v15  ;;  %v1195_v62 = vadd.s32 536870912, %v1194_v11 }
 0x1a0   : > { %2570 = vst [vmem:[%s3546_s29 + $0xe8] sm:$0xff] %v1986_v26  ;;  %v1999_v50 = vsub.f32 %v1995_v14, %v1965_v49  ;;  %v4024_v36 = vshrl.u32 %v1195_v62, 30 }
 0x1a2   : > { %v2003_v7 = vmul.f32 %v1999_v50, %v3870_v25  ;;  %v2012_v54 = vmul.f32 %v1999_v50, %v3934_v15  ;;  %v1197_v1 = vshll.u32 %v4024_v36, 30 }
 0x1a4   : > { %2574 = vst [vmem:[%s3546_s29 + $0x108] sm:$0xff] %v2003_v7  ;;  %v2016_v60 = vsub.f32 %v2012_v54, %v1982_v61  ;;  %v1198_v24 = vsub.s32 %v1194_v11, %v1197_v1 }
 0x1a6   : > { %v2020_v57 = vmul.f32 %v2016_v60, %v3870_v25  ;;  %v2029_v6 = vmul.f32 %v2016_v60, %v3934_v15  ;;  %vm1199_vm11 = vcmp.lt.s32.totalorder %v1198_v24, 0  ;;  %v1200_v23 = vsub.s32 0, %v1198_v24 }
 0x1a8   : > { %2578 = vst [vmem:[%s3546_s29 + $0x128] sm:$0xff] %v2020_v57  ;;  %v2033_v9 = vsub.f32 %v2029_v6, %v1999_v50 }
 0x1a9   : > { %2841 = shalt.err (!%p2838_p10)
}
 0x1aa   : > { %s2940_s22 = smov 128   ;;  %s2941_s19 = smov 256   ;;  %v2037_v51 = vmul.f32 %v2033_v9, %v3870_v25  ;;  %v2046_v5 = vmul.f32 %v2033_v9, %v3934_v15  ;;  %v1201_v16 = vsel %vm1199_vm11, %v1200_v23, %v1198_v24  ;;  %v1190_v44 = vadd.s32 %v4003_v31, %v4000_v19 }
 0x1ab   : > { %s2942_s23 = smov 8   ;;  %v1202_v43 = vclz %v1201_v16  ;;  %2812 = vrcp.f32 %v3799_v21  ;;  %vm1098_vm12 = vcmp.lt.s32.totalorder %v3815_v41, 0  ;;  %vm4079_vm13 = vcmp.le.f32.partialorder %v1096_v17, 0.7853982 }
 0x1ac   : > { %2641 = dma.vmem_to_hbm [thread:$0]  (%p3048_p5), %s2226_s18, 512, %s2228_s11, %s2199_s28, %s2940_s22, %s2941_s19, %s2942_s23   ;;  %v2050_v53 = vsub.f32 %v2046_v5, %v2016_v60  ;;  %v1220_v12 = vsub.s32 4, %v4024_v36  ;;  %vm546_vm14 = vcmp.lt.f32.partialorder %v3799_v21, 3.5  ;;  %vm550_vm15 = vcmp.gt.f32.partialorder %v3799_v21, 0.0 }
 0x1ad   : > { %2582 = vst [vmem:[%s3546_s29 + $0x148] sm:$0xff] %v2037_v51  ;;  %v2531_v55 = vadd.s32 4294967294, %v1202_v43  ;;  %vm554_vm0 = vmand %vm546_vm14, %vm550_vm15  ;;  %vm614_vm3 = vweird.f32 %v3799_v21  ;;  %s2204_s18 = scalar_lea.sflag [#allocation5], %s4034_s26 }
 0x1ae   : > { %v2054_v48 = vmul.f32 %v2050_v53, %v3870_v25  ;;  %v2063_v32 = vmul.f32 %v2050_v53, %v3934_v15  ;;  %v1221_v54 = vsel %vm1098_vm12, %v1220_v12, %v4024_v36 }
 0x1af   : > { %vm2532_vm9 = vcmp.lt.s32.totalorder %v2531_v55, 0 }
 0x1b0   : > { %2586 = vst [vmem:[%s3546_s29 + $0x168] sm:$0xff] %v2054_v48  ;;  %v2067_v13 = vsub.f32 %v2063_v32, %v2033_v9  ;;  %v1205_v52 = vsel %vm2532_vm9, 0, %v2531_v55  ;;  %v620_v32 = vand.u32 2147483648, %v3799_v21  ;;  %vm1239_vm9 = vweird.f32 %v3815_v41 }
 0x1b1   : > { %v1206_v33 = vsub.s32 32, %v1205_v52  ;;  %v1210_v46 = vsub.s32 4294967266, %v1205_v52  ;;  %v1207_v34 = vshll.u32 %v1198_v24, %v1205_v52  ;;  %v4069_v19 = vpop.eup %2812  ;;  %v1223_v24 = vsel %vm4079_vm13, 0, %v1221_v54 }
 0x1b2   : > { %v2071_v8 = vmul.f32 %v2067_v13, %v3870_v25  ;;  %v2080_v38 = vmul.f32 %v2067_v13, %v3934_v15  ;;  %v610_v37 = vmul.f32 %v4069_v19, %v3799_v21  ;;  %vm615_vm1 = vweird.f32 %v4069_v19 }
 0x1b3   : > { %v1208_v28 = vshrl.u32 %v1190_v44, %v1206_v33  ;;  %v1211_v59 = vadd.s32 127, %v1210_v46  ;;  %v1240_v48 = vadd.s32 3, %v1223_v24  ;;  %vm616_vm5 = vmor %vm614_vm3, %vm615_vm1  ;;  %v1857_v33 = vand.u32 3, %v1223_v24 }
 0x1b4   : > { %2590 = vst [vmem:[%s3546_s29 + $0x188] sm:$0xff] %v2071_v8  ;;  %v2084_v63 = vsub.f32 %v2080_v38, %v2050_v53  ;;  %v611_v11 = vsub.f32 1.0, %v610_v37  ;;  %v2520_v8 = vsel %vm554_vm0, 1.0, %v2939_v42 }
 0x1b5   : > { %v1209_v3 = vor.u32 %v1208_v28, %v1207_v34  ;;  %v1212_v2 = vshll.u32 %v1211_v59, 23  ;;  %v621_v28 = vor.u32 1.1754944e-38, %v620_v32  ;;  %vm1858_vm2 = vcmp.lt.s32.totalorder %v1857_v33, 2 }
 0x1b6   : > { %v2088_v20 = vmul.f32 %v2084_v63, %v3870_v25  ;;  %v2097_v58 = vmul.f32 %v2084_v63, %v3934_v15  ;;  %v612_v6 = vmul.f32 %v4069_v19, %v611_v11  ;;  %vm1859_vm4 = vcmp.eq.s32.totalorder %v1857_v33, 0 }
 0x1b7   : > { %v1213_v39 = vor.u32 4788187, %v1212_v2  ;;  %v1216_v27 = vcvt.s32.f32 %v1209_v3  ;;  %vm1862_vm11 = vcmp.eq.s32.totalorder %v1857_v33, 2 }
 0x1b8   : > { %2594 = vst [vmem:[%s3546_s29 + $0x1a8] sm:$0xff] %v2088_v20  ;;  %v2101_v29 = vsub.f32 %v2097_v58, %v2067_v13  ;;  %v613_v43 = vadd.f32 %v4069_v19, %v612_v6  ;;  %v566_v20 = vmul.f32 0.75592893, %v2520_v8 }
 0x1b9   : > { %v1214_v40 = vand.u32 2147483647, %v1213_v39 }
 0x1ba   : > { %v2105_v30 = vmul.f32 %v2101_v29, %v3870_v25  ;;  %v2114_v47 = vmul.f32 %v2101_v29, %v3934_v15  ;;  %v617_v46 = vsel %vm616_vm5, %v4069_v19, %v613_v43 }
 0x1bb   : > { %v1217_v49 = vmul.f32 %v1216_v27, %v1214_v40 }
 0x1bc   : > { %2598 = vst [vmem:[%s3546_s29 + $0x1c8] sm:$0xff] %v2105_v30  ;;  %v2118_v0 = vsub.f32 %v2114_v47, %v2084_v63  ;;  %v1241_v63 = vand.u32 3, %v1240_v48 }
 0x1bd   : > { %v1218_v31 = vxor.u32 2147483648, %v1217_v49 }
 0x1be   : > { %v2122_v22 = vmul.f32 %v2118_v0, %v3870_v25  ;;  %v2131_v4 = vmul.f32 %v2118_v0, %v3934_v15  ;;  %vm1242_vm7 = vcmp.lt.s32.totalorder %v1241_v63, 2  ;;  %vm1243_vm8 = vcmp.eq.s32.totalorder %v1241_v63, 0 }
 0x1bf   : > { %v1219_v45 = vsel %vm1098_vm12, %v1218_v31, %v1217_v49  ;;  %vm1246_vm10 = vcmp.eq.s32.totalorder %v1241_v63, 2 }
 0x1c0   : > { %2602 = vst [vmem:[%s3546_s29 + $0x1e8] sm:$0xff] %v2122_v22  ;;  %v2135_v35 = vsub.f32 %v2131_v4, %v2101_v29  ;;  %v1222_v26 = vsel %vm4079_vm13, %v3815_v41, %v1219_v45 }
 0x1c1   : > { %v1224_v14 = vmul.f32 %v1222_v26, %v1222_v26 }
 0x1c2   : > { %v2139_v61 = vmul.f32 %v2135_v35, %v3870_v25  ;;  %v2148_v18 = vmul.f32 %v2135_v35, %v3934_v15 }
 0x1c3   : > { %v1225_v17 = vmul.f32 -0.001358992, %v1224_v14  ;;  %v1232_v50 = vmul.f32 -0.00019511016, %v1224_v14 }
 0x1c4   : > { %2606 = vst [vmem:[%s3546_s29 + $0x208] sm:$0xff] %v2139_v61  ;;  %v2152_v56 = vsub.f32 %v2148_v18, %v2118_v0 }
 0x1c5   : > { %v1226_v60 = vadd.f32 0.041655596, %v1225_v17  ;;  %v1233_v1 = vadd.f32 0.008332121, %v1232_v50 }
 0x1c6   : > { %v2156_v62 = vmul.f32 %v2152_v56, %v3870_v25  ;;  %v2165_v7 = vmul.f32 %v2152_v56, %v3934_v15 }
 0x1c7   : > { %v1227_v9 = vmul.f32 %v1226_v60, %v1224_v14  ;;  %v1234_v23 = vmul.f32 %v1233_v1, %v1224_v14 }
 0x1c8   : > { %2610 = vst [vmem:[%s3546_s29 + $0x228] sm:$0xff] %v2156_v62  ;;  %v2169_v57 = vsub.f32 %v2165_v7, %v2135_v35 }
 0x1c9   : > { %v1228_v36 = vadd.f32 -0.4999988, %v1227_v9  ;;  %v1235_v16 = vadd.f32 -0.16666654, %v1234_v23 }
 0x1ca   : > { %v2173_v51 = vmul.f32 %v2169_v57, %v3870_v25  ;;  %v2182_v5 = vmul.f32 %v2169_v57, %v3934_v15  ;;  %v618_v15 = vand.u32 2147483647, %v3799_v21 }
 0x1cb   : > { %v1229_v55 = vmul.f32 %v1228_v36, %v1224_v14  ;;  %v1236_v13 = vmul.f32 %v1235_v16, %v1224_v14 }
 0x1cc   : > { %2614 = vst [vmem:[%s3546_s29 + $0x248] sm:$0xff] %v2173_v51  ;;  %v2186_v53 = vsub.f32 %v2182_v5, %v2152_v56  ;;  %vm619_vm6 = vcmp.eq.f32.partialorder %v618_v15, 8.507059e+37 }
 0x1cd   : > { %v1230_v38 = vadd.f32 1.0, %v1229_v55  ;;  %v1237_v44 = vadd.f32 1.0, %v1236_v13 }
 0x1ce   : > { %v2190_v52 = vmul.f32 %v2186_v53, %v3870_v25  ;;  %v622_v25 = vsel %vm619_vm6, %v621_v28, %v617_v46 }
 0x1cf   : > { %v1238_v34 = vmul.f32 %v1237_v44, %v1222_v26  ;;  %v1247_v59 = vxor.u32 2147483648, %v1230_v38  ;;  %v4111_v29 = vmul.f32 %v622_v25, %v566_v20 }
 0x1d0   : > { %2618 = vst [vmem:[%s3546_s29 + $0x268] sm:$0xff] %v2190_v52 }
 0x1d1   : > { %v1244_v58 = vxor.u32 2147483648, %v1238_v34  ;;  %v1248_v21 = vsel %vm1246_vm10, %v1247_v59, %v1238_v34  ;;  %v1864_v2 = vsel %vm1862_vm11, %v1247_v59, %v1238_v34 }
 0x1d3   : > { %v1245_v42 = vsel %vm1243_vm8, %v1230_v38, %v1244_v58  ;;  %v1861_v3 = vsel %vm1859_vm4, %v1230_v38, %v1244_v58 }
 0x1d4   : > { %v1249_v39 = vsel %vm1242_vm7, %v1245_v42, %v1248_v21  ;;  %v1865_v30 = vsel %vm1858_vm2, %v1861_v3, %v1864_v2 }
 0x1d5   : > { %v1250_v47 = vsel %vm1239_vm9, nan, %v1249_v39  ;;  %v1866_v40 = vsel %vm1239_vm9, nan, %v1865_v30 }
 0x1d6   : > { %v4114_v27 = vmul.f32 2.0, %v1866_v40  ;;  %v1874_v0 = vmul.f32 %v1250_v47, %v4111_v29 }
 0x1d8   : > { %1878 = vst [vmem:[%s3546_s29 + $0x18] sm:$0xff] %v1874_v0  ;;  %v1882_v19 = vmul.f32 %v4114_v27, %v1250_v47 }
 0x1da   : > { %v1886_v49 = vmul.f32 %v1882_v19, %v4111_v29  ;;  %v1895_v22 = vmul.f32 %v1882_v19, %v4114_v27 }
 0x1dc   : > { %2548 = vst [vmem:[%s3546_s29 + $0x38] sm:$0xff] %v1886_v49  ;;  %v1899_v41 = vsub.f32 %v1895_v22, %v1250_v47 }
 0x1de   : > { %v1903_v4 = vmul.f32 %v1899_v41, %v4111_v29  ;;  %v1912_v31 = vmul.f32 %v1899_v41, %v4114_v27 }
 0x1e0   : > { %2552 = vst [vmem:[%s3546_s29 + $0x58] sm:$0xff] %v1903_v4  ;;  %v1916_v35 = vsub.f32 %v1912_v31, %v1882_v19 }
 0x1e2   : > { %v1920_v37 = vmul.f32 %v1916_v35, %v4111_v29  ;;  %v1929_v10 = vmul.f32 %v1916_v35, %v4114_v27 }
 0x1e4   : > { %2556 = vst [vmem:[%s3546_s29 + $0x78] sm:$0xff] %v1920_v37  ;;  %v1933_v45 = vsub.f32 %v1929_v10, %v1899_v41 }
 0x1e6   : > { %v1937_v61 = vmul.f32 %v1933_v45, %v4111_v29  ;;  %v1946_v18 = vmul.f32 %v1933_v45, %v4114_v27 }
 0x1e8   : > { %2560 = vst [vmem:[%s3546_s29 + $0x98] sm:$0xff] %v1937_v61  ;;  %v1950_v12 = vsub.f32 %v1946_v18, %v1916_v35 }
 0x1ea   : > { %v1954_v26 = vmul.f32 %v1950_v12, %v4111_v29  ;;  %v1963_v14 = vmul.f32 %v1950_v12, %v4114_v27 }
 0x1ec   : > { %2564 = vst [vmem:[%s3546_s29 + $0xb8] sm:$0xff] %v1954_v26  ;;  %v1967_v56 = vsub.f32 %v1963_v14, %v1933_v45 }
 0x1ee   : > { %v1971_v11 = vmul.f32 %v1967_v56, %v4111_v29  ;;  %v1980_v17 = vmul.f32 %v1967_v56, %v4114_v27 }
 0x1f0   : > { %2568 = vst [vmem:[%s3546_s29 + $0xd8] sm:$0xff] %v1971_v11  ;;  %v1984_v50 = vsub.f32 %v1980_v17, %v1950_v12 }
 0x1f2   : > { %v1988_v62 = vmul.f32 %v1984_v50, %v4111_v29  ;;  %v1997_v7 = vmul.f32 %v1984_v50, %v4114_v27 }
 0x1f4   : > { %2572 = vst [vmem:[%s3546_s29 + $0xf8] sm:$0xff] %v1988_v62  ;;  %v2001_v54 = vsub.f32 %v1997_v7, %v1967_v56 }
 0x1f6   : > { %v2005_v60 = vmul.f32 %v2001_v54, %v4111_v29  ;;  %v2014_v1 = vmul.f32 %v2001_v54, %v4114_v27 }
 0x1f8   : > { %2576 = vst [vmem:[%s3546_s29 + $0x118] sm:$0xff] %v2005_v60  ;;  %v2018_v57 = vsub.f32 %v2014_v1, %v1984_v50 }
 0x1fa   : > { %v2022_v6 = vmul.f32 %v2018_v57, %v4111_v29  ;;  %v2031_v24 = vmul.f32 %v2018_v57, %v4114_v27 }
 0x1fc   : > { %2580 = vst [vmem:[%s3546_s29 + $0x138] sm:$0xff] %v2022_v6  ;;  %v2035_v9 = vsub.f32 %v2031_v24, %v2001_v54 }
 0x1fe   : > { %v2039_v23 = vmul.f32 %v2035_v9, %v4111_v29  ;;  %v2048_v51 = vmul.f32 %v2035_v9, %v4114_v27 }
 0x200   : > { %2584 = vst [vmem:[%s3546_s29 + $0x158] sm:$0xff] %v2039_v23  ;;  %v2052_v5 = vsub.f32 %v2048_v51, %v2018_v57 }
 0x202   : > { %v2056_v36 = vmul.f32 %v2052_v5, %v4111_v29  ;;  %v2065_v16 = vmul.f32 %v2052_v5, %v4114_v27 }
 0x204   : > { %2588 = vst [vmem:[%s3546_s29 + $0x178] sm:$0xff] %v2056_v36  ;;  %v2069_v53 = vsub.f32 %v2065_v16, %v2035_v9 }
 0x206   : > { %v2073_v43 = vmul.f32 %v2069_v53, %v4111_v29  ;;  %v2082_v48 = vmul.f32 %v2069_v53, %v4114_v27 }
 0x208   : > { %2592 = vst [vmem:[%s3546_s29 + $0x198] sm:$0xff] %v2073_v43  ;;  %v2086_v32 = vsub.f32 %v2082_v48, %v2052_v5 }
 0x20a   : > { %v2090_v55 = vmul.f32 %v2086_v32, %v4111_v29  ;;  %v2099_v13 = vmul.f32 %v2086_v32, %v4114_v27 }
 0x20c   : > { %2596 = vst [vmem:[%s3546_s29 + $0x1b8] sm:$0xff] %v2090_v55  ;;  %v2103_v52 = vsub.f32 %v2099_v13, %v2069_v53 }
 0x20e   : > { %v2107_v15 = vmul.f32 %v2103_v52, %v4111_v29  ;;  %v2116_v8 = vmul.f32 %v2103_v52, %v4114_v27 }
 0x210   : > { %2600 = vst [vmem:[%s3546_s29 + $0x1d8] sm:$0xff] %v2107_v15  ;;  %v2120_v38 = vsub.f32 %v2116_v8, %v2086_v32 }
 0x212   : > { %v2124_v44 = vmul.f32 %v2120_v38, %v4111_v29  ;;  %v2133_v33 = vmul.f32 %v2120_v38, %v4114_v27 }
 0x214   : > { %2604 = vst [vmem:[%s3546_s29 + $0x1f8] sm:$0xff] %v2124_v44  ;;  %v2137_v46 = vsub.f32 %v2133_v33, %v2103_v52 }
 0x216   : > { %v2141_v63 = vmul.f32 %v2137_v46, %v4111_v29  ;;  %v2150_v28 = vmul.f32 %v2137_v46, %v4114_v27 }
 0x218   : > { %2608 = vst [vmem:[%s3546_s29 + $0x218] sm:$0xff] %v2141_v63  ;;  %v2154_v34 = vsub.f32 %v2150_v28, %v2120_v38 }
 0x21a   : > { %v2158_v59 = vmul.f32 %v2154_v34, %v4111_v29  ;;  %v2167_v20 = vmul.f32 %v2154_v34, %v4114_v27 }
 0x21c   : > { %2612 = vst [vmem:[%s3546_s29 + $0x238] sm:$0xff] %v2158_v59  ;;  %v2171_v25 = vsub.f32 %v2167_v20, %v2137_v46 }
 0x21e   : > { %v2175_v58 = vmul.f32 %v2171_v25, %v4111_v29  ;;  %v2184_v42 = vmul.f32 %v2171_v25, %v4114_v27 }
 0x220   : > { %2616 = vst [vmem:[%s3546_s29 + $0x258] sm:$0xff] %v2175_v58  ;;  %v2188_v21 = vsub.f32 %v2184_v42, %v2154_v34 }
 0x222   : > { %v2192_v3 = vmul.f32 %v2188_v21, %v4111_v29 }
 0x224   : > { %2620 = vst [vmem:[%s3546_s29 + $0x278] sm:$0xff] %v2192_v3 }
 0x225   : > { %s2639_s11 = smul.u32 48, %s2912_s20  ;;  %s2256_s28 = sshll.u32 %s3192_s25, 4  ;;  %s2257_s28 = int_to_ptr.vmem [resolvable:$true] %s2256_s28 }
 0x226   : > { %s2943_s13 = smov 512   ;;  %s2944_s10 = smov 2048  }
 0x227   : > { %s2243_s27 = sadd.s32 %s2639_s11, %s4018_s14  ;;  %2642 = sst [smem:[#allocation8]] (%p3048_p5), %s2943_s13 }
 0x228   : > { %s2628_s6 = sshll.u32 %s2243_s27, 3  ;;  %2643 = sst [smem:[#allocation8 + $0x1]] (%p3048_p5), %s2944_s10 }
 0x229   : > { %s2245_s9 = scalar_lea.hbm %s4259_s3, %s2628_s6  ;;  %s2945_s25 = smov 4  }
 0x22a   : > { %s2258_s22 = sshll.u32 %s2245_s9, 4  ;;  %2644 = sst [smem:[#allocation8 + $0x2]] (%p3048_p5), %s2945_s25  ;;  %s2259_s22 = int_to_ptr.hbm [resolvable:$true] %s2258_s22 }
 0x22b   : > { %s2946_s19 = smov 128   ;;  %s2947_s23 = smov 256  }
 0x22c   : > { %2645 = sst [smem:[#allocation8 + $0x3]] (%p3048_p5), %s2946_s19  ;;  %s2948_s11 = smov 8  }
 0x22d   : > { %2646 = sst [smem:[#allocation8 + $0x4]] (%p3048_p5), %s2947_s23  ;;  %s2949_s27 = smov [#allocation7]  }
 0x22e   : > { %2647 = sst [smem:[#allocation8 + $0x5]] (%p3048_p5), %s2948_s11  ;;  %s2950_s13 = smov 0  }
 0x22f   : > { %2648 = dma.general (%p3048_p5), %s2257_s28, 1536, %s2259_s22, %s2204_s18, %s2949_s27, [#allocation8], %s2950_s13, 0  }
 0x230   : > { %s2640_s6 = smul.u32 320, %s2912_s20  ;;  %s2300_s7 = sshll.u32 %s3546_s29, 4  ;;  %s2301_s7 = int_to_ptr.vmem [resolvable:$true] %s2300_s7 }
 0x231   : > { %s2951_s9 = smov 512   ;;  %s2952_s22 = smov 2048  }
 0x232   : > { %s2287_s8 = sadd.s32 %s2640_s6, %s4018_s14  ;;  %2649 = sst [smem:[#allocation10]] (%p3048_p5), %s2951_s9 }
 0x233   : > { %s2631_s10 = sshll.u32 %s2287_s8, 3  ;;  %2650 = sst [smem:[#allocation10 + $0x1]] (%p3048_p5), %s2952_s22 }
 0x234   : > { %s2289_s28 = scalar_lea.hbm %s4260_s4, %s2631_s10  ;;  %s2953_s20 = smov 4  }
 0x235   : > { %s2302_s23 = sshll.u32 %s2289_s28, 4  ;;  %2651 = sst [smem:[#allocation10 + $0x2]] (%p3048_p5), %s2953_s20  ;;  %s2303_s23 = int_to_ptr.hbm [resolvable:$true] %s2302_s23 }
 0x236   : > { %s2954_s29 = smov 128   ;;  %s2955_s14 = smov 256  }
 0x237   : > { %2652 = sst [smem:[#allocation10 + $0x3]] (%p3048_p5), %s2954_s29  ;;  %s2956_s11 = smov 8  }
 0x238   : > { %2653 = sst [smem:[#allocation10 + $0x4]] (%p3048_p5), %s2955_s14  ;;  %s2957_s27 = smov [#allocation9]  }
 0x239   : > { %2654 = sst [smem:[#allocation10 + $0x5]] (%p3048_p5), %s2956_s11  ;;  %s2958_s13 = smov 0  }
 0x23a   : > { %2655 = dma.general (%p3048_p5), %s2301_s7, 10240, %s2303_s23, %s2204_s18, %s2957_s27, [#allocation10], %s2958_s13, 0  }
 0x23b PF: > { %p2669_p11 = scmp.ge.s32.totalorder %s2928_s24, 2  ;;  %s2330_s6 = sand.u32 1, %s2892_s15  }
 0x23c   : > { %s2331_s8 = scalar_lea.sflag [#allocation3], %s2330_s6 }
 0x23d   : > { %p2660_p12 = pnand %p2669_p11, %p3057_p7 }
 0x23f   : > { %p2661_p13 = pneg %p2660_p12 }
 0x241   : > { %2883 = dma.done.wait (%p2661_p13), %s2331_s8, 512  }
 0x242   : > { %2885 = vsyncadd (%p2661_p13), %s2331_s8, 4294966784  ;;  %s4296_s9 = sadd.s32 4294967294, %s2928_s24  }
 0x243   : > { %s2340_s10 = sand.u32 1, %s4296_s9  }
 0x244   : > { %s2341_s25 = scalar_lea.sflag [#allocation5], %s2340_s10 }
 0x245   : > { %2887 = dma.done.wait (%p2661_p13), %s2341_s25, 11776  }
 0x246   : > { %2889 = vsyncadd (%p2661_p13), %s2341_s25, 4294955520  ;;  %s21_s24 = sadd.s32 1, %s2928_s24   ;;  %s4297_s19 = sld [smem:[#allocation13_spill]] }
 0x247   : > { %p18_p5 = scmp.ge.s32.totalorder %s21_s24, 10   ;;  %s4298_s20 = sld [smem:[#allocation14_spill]] }
 0x248   : > { %s4299_s30 = sld [smem:[#allocation15_spill]]  ;;  %s4302_s15 = smov %s2896_s16 }
 0x249   : > { %s4300_s22 = sld [smem:[#allocation16_spill]]  ;;  %s4303_s16 = smov %s2900_s17 }
 0x24a   : > { %s4301_s23 = sld [smem:[#allocation17_spill]]  ;;  %s4304_s17 = smov %s3073_s12 }
 0x24b   : > { %s4305_s18 = smov %s2916_s21  ;;  %20 = sbr.rel (!%p18_p5) target bundleno = 8 (0x8), region = 129 }
 0x24e   : > { %s4306_s21 = smov %s4299_s30 }
 0x250   :  { %2357 = vsyncpa [#allocation3], 1 }
 0x251   :  { %2359 = vsyncpa [#allocation3 + $0x1], 1 }
 0x252   :  { %2360 = vsyncpa [#allocation5], 1 }
 0x253   :  { %2362 = vsyncpa [#allocation5 + $0x1], 1 }

</bundles_post_ra>
